<compile_context>
chip_gen: v6e
topology: v6e:2x2x1
jax: 0.10.0
libtpu: 0.0.40
codegen_flags: <defaults>
</compile_context>

<pallas_src>
import functools

import jax
import jax.numpy as jnp
from jax.experimental import pallas as pl
from jax.experimental.pallas import tpu as pltpu


CFG = dict(
    vocab=128, max_pos=16, type_vocab=2,
    D=128, H=2, L=2, FF=512, num_classes=8,
)


# ----------------------------- fused encoder kernel ------------------------------

def _encoder_kernel(emb_ref, emb_g_ref, emb_b_ref,
                    wqkv_ref, bqkv_ref, wo_ref, bo_ref, ln1g_ref, ln1b_ref,
                    wi_ref, bi_ref, wo2_ref, bo2_ref, ln2g_ref, ln2b_ref,
                    fcwt_ref, fcb_ref,
                    logits_ref, probs_ref,
                    x_scratch,
                    *, batch, seq, num_heads, head_dim, eps):
    """One grid step = one encoder layer, whole batch resident in VMEM.

    Grid = (L,), 'arbitrary': the activation carried in x_scratch flows layer->layer
    entirely in VMEM; per-layer weights are indexed by the layer axis and are
    double-buffered by the BlockSpec pipeline (next layer prefetched during compute).
    """
    layer = pl.program_id(0)
    d_model = num_heads * head_dim
    scale = 1.0 / (head_dim ** 0.5)

    def _ln(x, g, b):
        m = jnp.mean(x, axis=-1, keepdims=True)
        xc = x - m
        var = jnp.mean(xc * xc, axis=-1, keepdims=True)
        return xc * jax.lax.rsqrt(var + eps) * g + b

    def _gelu(x):
        # TODO(synk): HF BertModel defaults to exact-erf GELU; tanh approx ("gelu_new")
        # differs by < 1e-3 and is used here (matches the in-script reference).
        return 0.5 * x * (1.0 + jnp.tanh(0.7978845608028654 * (x + 0.044715 * x * x * x)))

    # ---- layer 0: embedding LayerNorm fused here (init the resident activation) ----
    @pl.when(layer == 0)
    def _():
        x_scratch[...] = _ln(emb_ref[...], emb_g_ref[...], emb_b_ref[...])

    x = x_scratch[...]                               # (B*S, D) f32, resident across layers

    # ---- fused QKV projection: one (B*S,D)@(D,3D) bf16 MXU pass ----
    qkv = jnp.dot(x.astype(jnp.bfloat16), wqkv_ref[...],
                  preferred_element_type=jnp.float32) + bqkv_ref[...]      # (B*S, 3D) f32
    q = qkv[:, 0:d_model].astype(jnp.bfloat16)
    k = qkv[:, d_model:2 * d_model].astype(jnp.bfloat16)
    v = qkv[:, 2 * d_model:3 * d_model].astype(jnp.bfloat16)
    wo = wo_ref[...]                                 # (D, D) bf16

    # ---- multi-head self-attention; (batch, head) unrolled in-kernel ----
    attn_rows = []
    for b in range(batch):
        r0 = b * seq
        acc_b = None
        head_flat = []                               # 16 x (1, S) chunks -> one 128-lane row
        for h in range(num_heads):
            lo = h * head_dim
            qh = q[r0:r0 + seq, lo:lo + head_dim]
            kh = k[r0:r0 + seq, lo:lo + head_dim]
            vh = v[r0:r0 + seq, lo:lo + head_dim]
            s = jax.lax.dot_general(qh, kh, (((1,), (1,)), ((), ())),
                                    preferred_element_type=jnp.float32) * scale   # (S, S)
            s = s - jnp.max(s, axis=-1, keepdims=True)
            e = jnp.exp(s)
            # EUP approx reciprocal: probs rows sum to 1 +/- ~1e-3 (external output).
            p = e * pl.reciprocal(jnp.sum(e, axis=-1, keepdims=True), approx=True)
            head_flat.extend([p[i:i + 1, :] for i in range(seq)])
            ctx_h = jnp.dot(p.astype(jnp.bfloat16), vh,
                            preferred_element_type=jnp.float32)                   # (S, dh)
            # Fold context straight into the output projection: no lane-axis head concat.
            contrib = jnp.dot(ctx_h.astype(jnp.bfloat16), wo[lo:lo + head_dim, :],
                              preferred_element_type=jnp.float32)                 # (S, D)
            acc_b = contrib if acc_b is None else acc_b + contrib
        # One lane-dense (1, H*S*S) = (1, 128) store per batch element (no 8-wide vst.msk).
        probs_ref[b:b + 1, :] = jnp.concatenate(head_flat, axis=1)
        attn_rows.append(acc_b)

    attn_out = jnp.concatenate(attn_rows, axis=0) + bo_ref[...]           # (B*S, D)
    x1 = _ln(attn_out + x, ln1g_ref[...], ln1b_ref[...])

    # ---- feed-forward (dense + GELU + dense) + residual + LayerNorm (fused) ----
    inter = _gelu(jnp.dot(x1.astype(jnp.bfloat16), wi_ref[...],
                          preferred_element_type=jnp.float32) + bi_ref[...])
    ffn_out = jnp.dot(inter.astype(jnp.bfloat16), wo2_ref[...],
                      preferred_element_type=jnp.float32) + bo2_ref[...]
    x2 = _ln(ffn_out + x1, ln2g_ref[...], ln2b_ref[...])
    x_scratch[...] = x2

    # ---- classifier head folded into the last layer step (fc_w stored transposed) ----
    @pl.when(layer == pl.num_programs(0) - 1)
    def _():
        for b in range(batch):
            cls = x2[b * seq:b * seq + 1, :]                               # (1, D) CLS row
            logits_ref[b:b + 1, :] = (
                jax.lax.dot_general(cls, fcwt_ref[...], (((1,), (1,)), ((), ())),
                                    preferred_element_type=jnp.float32)
                + fcb_ref[...])


# ----------------------------- model forward ------------------------------

def bert_classifier_forward(params, input_ids, cfg):
    """Mirrors BertClassifier.forward: returns (logits[B, 8], tuple of attention probs)."""
    B, S = input_ids.shape
    D, H, L, FF, C = cfg["D"], cfg["H"], cfg["L"], cfg["FF"], cfg["num_classes"]
    dh = D // H

    # Embedding gather + sum (glue); LayerNorm is fused into the kernel's first layer step.
    # TODO(synk): embedding gather stays in JAX (jnp.take); a data-dependent in-kernel
    # gather would need scalar-prefetch Element indexing and buys nothing at this size.
    tok = jnp.take(params["word_emb"], input_ids, axis=0)                 # (B, S, D)
    emb = tok + params["pos_emb"][:S][None, :, :] + params["type_emb"][0][None, None, :]
    emb = emb.reshape(B * S, D).astype(jnp.float32)                       # batch folded in

    kernel = functools.partial(_encoder_kernel, batch=B, seq=S,
                               num_heads=H, head_dim=dh, eps=1e-12)

    # Advisory cost estimate (lets XLA schedule the gather/reshape glue around the call).
    flops_per_layer = (2 * B * S * D * 3 * D                # QKV projection
                       + B * H * (2 * S * S * dh) * 2       # scores + context
                       + 2 * B * S * D * D                  # attention output projection
                       + 2 * B * S * D * FF * 2)            # FFN in + out
    flops = L * flops_per_layer + 2 * B * D * C
    transcendentals = L * B * (H * S * S + S * FF)          # softmax exp + GELU tanh
    weight_bytes_per_layer = (2 * (D * 3 * D + D * D + D * FF + FF * D)   # bf16 matmul weights
                              + 4 * (3 * D + 6 * D + FF))                 # f32 biases / LN
    bytes_accessed = (L * weight_bytes_per_layer
                      + B * S * D * 4                                     # embedding slab in
                      + L * B * H * S * S * 4                             # probs out
                      + (C * D + C + B * C) * 4)                          # classifier head
    cost = pl.CostEstimate(flops=flops, transcendentals=transcendentals,
                           bytes_accessed=bytes_accessed)

    logits, probs_flat = pl.pallas_call(
        kernel,
        out_shape=(
            jax.ShapeDtypeStruct((B, C), jnp.float32),                    # logits
            jax.ShapeDtypeStruct((L, B, H * S * S), jnp.float32),         # lane-dense probs
        ),
        grid=(L,),
        in_specs=[
            pl.BlockSpec((B * S, D), lambda l: (0, 0)),                   # emb (post sum)
            pl.BlockSpec((1, D), lambda l: (0, 0)),                       # emb_ln_g
            pl.BlockSpec((1, D), lambda l: (0, 0)),                       # emb_ln_b
            pl.BlockSpec((None, D, 3 * D), lambda l: (l, 0, 0)),          # w_qkv (bf16)
            pl.BlockSpec((None, 1, 3 * D), lambda l: (l, 0, 0)),          # b_qkv
            pl.BlockSpec((None, D, D), lambda l: (l, 0, 0)),              # w_o   (bf16)
            pl.BlockSpec((None, 1, D), lambda l: (l, 0, 0)),              # b_o
            pl.BlockSpec((None, 1, D), lambda l: (l, 0, 0)),              # ln1_g
            pl.BlockSpec((None, 1, D), lambda l: (l, 0, 0)),              # ln1_b
            pl.BlockSpec((None, D, FF), lambda l: (l, 0, 0)),             # w_i   (bf16)
            pl.BlockSpec((None, 1, FF), lambda l: (l, 0, 0)),             # b_i
            pl.BlockSpec((None, FF, D), lambda l: (l, 0, 0)),             # w_o2  (bf16)
            pl.BlockSpec((None, 1, D), lambda l: (l, 0, 0)),              # b_o2
            pl.BlockSpec((None, 1, D), lambda l: (l, 0, 0)),              # ln2_g
            pl.BlockSpec((None, 1, D), lambda l: (l, 0, 0)),              # ln2_b
            pl.BlockSpec((C, D), lambda l: (0, 0)),                       # fc_w_t (C, D)
            pl.BlockSpec((1, C), lambda l: (0, 0)),                       # fc_b
        ],
        out_specs=(
            pl.BlockSpec((B, C), lambda l: (0, 0)),                       # logits (written once)
            pl.BlockSpec((None, B, H * S * S), lambda l: (l, 0, 0)),      # probs (128 lanes)
        ),
        scratch_shapes=[pltpu.VMEM((B * S, D), jnp.float32)],             # resident activation
        compiler_params=pltpu.CompilerParams(
            # Single sequential layer axis; at B=2, S=8 per-core work is below the per-step
            # overhead, so no explicit core split.
            # TODO(synk): at real BERT-base scale (D=768, FF=3072, S>=128, L=12) set
            # vmem_limit_bytes explicitly, tile the FFN matmuls over K/FF (v7x 64 MiB VMEM),
            # emit probs in bf16, and add an explicit batch/core-split grid axis.
            dimension_semantics=("arbitrary",),
        ),
        cost_estimate=cost,
    )(emb,
      params["emb_ln_g"], params["emb_ln_b"],
      params["w_qkv"], params["b_qkv"],
      params["w_o"], params["b_o"],
      params["ln1_g"], params["ln1_b"],
      params["w_i"], params["b_i"],
      params["w_o2"], params["b_o2"],
      params["ln2_g"], params["ln2_b"],
      params["fc_w_t"], params["fc_b"])

    attn = probs_flat.reshape(L, B, H, S, S)
    attentions = tuple(attn[i] for i in range(L))
    return logits, attentions


# ----------------------------- params ------------------------------

def init_params(key, cfg):
    D, FF, L, C = cfg["D"], cfg["FF"], cfg["L"], cfg["num_classes"]
    std = 0.02
    keys = iter(jax.random.split(key, 64))

    def nrm(shape, dtype=jnp.float32):
        return (std * jax.random.normal(next(keys), shape)).astype(dtype)

    wdt = jnp.bfloat16  # matmul weights stored in bf16 (native MXU path, half the DMA)
    # TODO(synk): real pretrained 'cl-tohoku/bert-base-japanese' weights can't be loaded
    # here (no file/network access); synthetic weights with a shrunk config are used.
    p = {
        "word_emb": nrm((cfg["vocab"], D)),
        "pos_emb": nrm((cfg["max_pos"], D)),
        "type_emb": nrm((cfg["type_vocab"], D)),
        "emb_ln_g": jnp.float32(1.0) + nrm((1, D)),
        "emb_ln_b": nrm((1, D)),
        # per-layer weights stacked on a leading L axis, indexed by the layer grid axis
        "w_qkv": nrm((L, D, 3 * D), wdt),
        "b_qkv": nrm((L, 1, 3 * D)),
        "w_o": nrm((L, D, D), wdt),
        "b_o": nrm((L, 1, D)),
        "ln1_g": jnp.float32(1.0) + nrm((L, 1, D)),
        "ln1_b": nrm((L, 1, D)),
        "w_i": nrm((L, D, FF), wdt),
        "b_i": nrm((L, 1, FF)),
        "w_o2": nrm((L, FF, D), wdt),
        "b_o2": nrm((L, 1, D)),
        "ln2_g": jnp.float32(1.0) + nrm((L, 1, D)),
        "ln2_b": nrm((L, 1, D)),
        "fc_w_t": nrm((C, D)),      # classifier weight stored transposed (lane-dense tile)
        "fc_b": nrm((1, C)),
    }
    return p


# ----------------------------- pure-JAX reference ------------------------------

def _ref_forward(params, input_ids, cfg):
    B, S = input_ids.shape
    D, H, L = cfg["D"], cfg["H"], cfg["L"]
    dh = D // H
    f32 = lambda a: a.astype(jnp.float32)

    def ln(x, g, b):
        m = jnp.mean(x, -1, keepdims=True)
        v = jnp.mean((x - m) ** 2, -1, keepdims=True)
        return (x - m) * jax.lax.rsqrt(v + 1e-12) * g + b

    def gelu(x):
        return 0.5 * x * (1.0 + jnp.tanh(0.7978845608028654 * (x + 0.044715 * x ** 3)))

    tok = jnp.take(params["word_emb"], input_ids, axis=0)
    emb = tok + params["pos_emb"][:S][None] + params["type_emb"][0][None, None]
    x = ln(emb.reshape(B * S, D), params["emb_ln_g"], params["emb_ln_b"])
    atts = []
    for l in range(L):
        qkv = x @ f32(params["w_qkv"][l]) + params["b_qkv"][l]
        q, k, v = qkv[:, :D], qkv[:, D:2 * D], qkv[:, 2 * D:]

        def heads(t):
            return t.reshape(B, S, H, dh).transpose(0, 2, 1, 3)

        qh, kh, vh = heads(q), heads(k), heads(v)
        s = jnp.einsum("bhqd,bhkd->bhqk", qh, kh) / (dh ** 0.5)
        p = jax.nn.softmax(s, -1)
        atts.append(p)
        ctx = jnp.einsum("bhqk,bhkd->bhqd", p, vh).transpose(0, 2, 1, 3).reshape(B * S, D)
        x = ln(ctx @ f32(params["w_o"][l]) + params["b_o"][l] + x,
               params["ln1_g"][l], params["ln1_b"][l])
        f = gelu(x @ f32(params["w_i"][l]) + params["b_i"][l]) @ f32(params["w_o2"][l]) \
            + params["b_o2"][l]
        x = ln(f + x, params["ln2_g"][l], params["ln2_b"][l])
    cls = x.reshape(B, S, D)[:, 0, :]
    return cls @ params["fc_w_t"].T + params["fc_b"], tuple(atts)


# ----------------------------- main ------------------------------

if __name__ == "__main__":
    key = jax.random.PRNGKey(0)
    pkey, dkey = jax.random.split(key)
    params = init_params(pkey, CFG)

    B, S = 2, 8
    input_ids = jax.random.randint(dkey, (B, S), 0, CFG["vocab"], dtype=jnp.int32)

    fwd = jax.jit(functools.partial(bert_classifier_forward, cfg=CFG))
    logits, attns = fwd(params, input_ids)
    logits = jax.block_until_ready(logits)
    attns = jax.block_until_ready(attns)

    ref_logits, ref_attns = _ref_forward(params, input_ids, CFG)

    assert logits.shape == (B, CFG["num_classes"])
    assert len(attns) == CFG["L"] and attns[0].shape == (B, CFG["H"], S, S)
    # Kernel does bf16 MXU matmuls (f32 accumulate) + approx softmax reciprocal, so allow
    # a slightly looser tolerance than a pure-f32 comparison.
    assert jnp.allclose(logits, ref_logits, atol=2e-2, rtol=2e-2), (
        jnp.max(jnp.abs(logits - ref_logits)))
    for a, ra in zip(attns, ref_attns):
        assert jnp.allclose(a, ra, atol=1e-2, rtol=1e-2), jnp.max(jnp.abs(a - ra))

    print("KERNEL_OK")
</pallas_src>

<mosaic_0001>
module attributes {stable_mosaic.version = 11 : i64} {
  func.func @_encoder_kernel(%arg0: i32, %arg1: memref<16x128xf32, #tpu.memory_space<vmem>>, %arg2: memref<1x128xf32, #tpu.memory_space<vmem>>, %arg3: memref<1x128xf32, #tpu.memory_space<vmem>>, %arg4: memref<1x128x384xbf16, #tpu.memory_space<vmem>>, %arg5: memref<1x1x384xf32, #tpu.memory_space<vmem>>, %arg6: memref<1x128x128xbf16, #tpu.memory_space<vmem>>, %arg7: memref<1x1x128xf32, #tpu.memory_space<vmem>>, %arg8: memref<1x1x128xf32, #tpu.memory_space<vmem>>, %arg9: memref<1x1x128xf32, #tpu.memory_space<vmem>>, %arg10: memref<1x128x512xbf16, #tpu.memory_space<vmem>>, %arg11: memref<1x1x512xf32, #tpu.memory_space<vmem>>, %arg12: memref<1x512x128xbf16, #tpu.memory_space<vmem>>, %arg13: memref<1x1x128xf32, #tpu.memory_space<vmem>>, %arg14: memref<1x1x128xf32, #tpu.memory_space<vmem>>, %arg15: memref<1x1x128xf32, #tpu.memory_space<vmem>>, %arg16: memref<8x128xf32, #tpu.memory_space<vmem>>, %arg17: memref<1x8xf32, #tpu.memory_space<vmem>>, %arg18: memref<2x8xf32, #tpu.memory_space<vmem>>, %arg19: memref<1x2x128xf32, #tpu.memory_space<vmem>>, %arg20: memref<16x128xf32, #tpu.memory_space<vmem>>) attributes {dimension_semantics = [#tpu.dimension_semantics<arbitrary>], iteration_bounds = array<i64: 2>, scalar_prefetch = 0 : i64, scratch_operands = 1 : i64, tpu.core_type = #tpu.core_type<tc>, window_params = [{pipeline_mode = #tpu.pipeline_mode<synchronous>, transform_indices = @transform_0, window_bounds = array<i64: 16, 128>}, {pipeline_mode = #tpu.pipeline_mode<synchronous>, transform_indices = @transform_1, window_bounds = array<i64: 1, 128>}, {pipeline_mode = #tpu.pipeline_mode<synchronous>, transform_indices = @transform_2, window_bounds = array<i64: 1, 128>}, {transform_indices = @transform_3, window_bounds = array<i64: 1, 128, 384>}, {transform_indices = @transform_4, window_bounds = array<i64: 1, 1, 384>}, {transform_indices = @transform_5, window_bounds = array<i64: 1, 128, 128>}, {transform_indices = @transform_6, window_bounds = array<i64: 1, 1, 128>}, {transform_indices = @transform_7, window_bounds = array<i64: 1, 1, 128>}, {transform_indices = @transform_8, window_bounds = array<i64: 1, 1, 128>}, {transform_indices = @transform_9, window_bounds = array<i64: 1, 128, 512>}, {transform_indices = @transform_10, window_bounds = array<i64: 1, 1, 512>}, {transform_indices = @transform_11, window_bounds = array<i64: 1, 512, 128>}, {transform_indices = @transform_12, window_bounds = array<i64: 1, 1, 128>}, {transform_indices = @transform_13, window_bounds = array<i64: 1, 1, 128>}, {transform_indices = @transform_14, window_bounds = array<i64: 1, 1, 128>}, {pipeline_mode = #tpu.pipeline_mode<synchronous>, transform_indices = @transform_15, window_bounds = array<i64: 8, 128>}, {pipeline_mode = #tpu.pipeline_mode<synchronous>, transform_indices = @transform_16, window_bounds = array<i64: 1, 8>}, {pipeline_mode = #tpu.pipeline_mode<synchronous>, transform_indices = @transform_17, window_bounds = array<i64: 2, 8>}, {transform_indices = @transform_18, window_bounds = array<i64: 1, 2, 128>}]} {
    %c0_i32 = arith.constant 0 : i32
    %0 = arith.cmpi eq, %arg0, %c0_i32 : i32
    %1 = arith.extui %0 : i1 to i32
    %c0_i32_0 = arith.constant 0 : i32
    %2 = arith.cmpi ne, %1, %c0_i32_0 : i32
    scf.if %2 {
      %c0_86 = arith.constant 0 : index
      %c0_87 = arith.constant 0 : index
      %234 = vector.load %arg1[%c0_86, %c0_87] : memref<16x128xf32, #tpu.memory_space<vmem>>, vector<16x128xf32>
      %c0_88 = arith.constant 0 : index
      %c0_89 = arith.constant 0 : index
      %235 = vector.load %arg2[%c0_88, %c0_89] : memref<1x128xf32, #tpu.memory_space<vmem>>, vector<1x128xf32>
      %c0_90 = arith.constant 0 : index
      %c0_91 = arith.constant 0 : index
      %236 = vector.load %arg3[%c0_90, %c0_91] : memref<1x128xf32, #tpu.memory_space<vmem>>, vector<1x128xf32>
      %cst_92 = arith.constant dense<0.000000e+00> : vector<16xf32>
      %237 = vector.multi_reduction <add>, %234, %cst_92 [1] : vector<16x128xf32> to vector<16xf32>
      %238 = vector.shape_cast %237 : vector<16xf32> to vector<16x1xf32>
      %cst_93 = arith.constant 1.280000e+02 : f32
      %239 = vector.broadcast %cst_93 : f32 to vector<16x1xf32>
      %240 = arith.divf %238, %239 : vector<16x1xf32>
      %241 = vector.broadcast %240 : vector<16x1xf32> to vector<16x128xf32>
      %242 = arith.subf %234, %241 : vector<16x128xf32>
      %243 = arith.mulf %242, %242 : vector<16x128xf32>
      %cst_94 = arith.constant dense<0.000000e+00> : vector<16xf32>
      %244 = vector.multi_reduction <add>, %243, %cst_94 [1] : vector<16x128xf32> to vector<16xf32>
      %245 = vector.shape_cast %244 : vector<16xf32> to vector<16x1xf32>
      %cst_95 = arith.constant 1.280000e+02 : f32
      %246 = vector.broadcast %cst_95 : f32 to vector<16x1xf32>
      %247 = arith.divf %245, %246 : vector<16x1xf32>
      %cst_96 = arith.constant 9.99999996E-13 : f32
      %248 = vector.broadcast %cst_96 : f32 to vector<16x1xf32>
      %249 = arith.addf %247, %248 : vector<16x1xf32>
      %250 = math.rsqrt %249 : vector<16x1xf32>
      %251 = vector.broadcast %250 : vector<16x1xf32> to vector<16x128xf32>
      %252 = arith.mulf %242, %251 : vector<16x128xf32>
      %253 = vector.broadcast %235 : vector<1x128xf32> to vector<16x128xf32>
      %254 = arith.mulf %252, %253 : vector<16x128xf32>
      %255 = vector.broadcast %236 : vector<1x128xf32> to vector<16x128xf32>
      %256 = arith.addf %254, %255 : vector<16x128xf32>
      %c0_97 = arith.constant 0 : index
      %c0_98 = arith.constant 0 : index
      %257 = vector.load %arg20[%c0_97, %c0_98] : memref<16x128xf32, #tpu.memory_space<vmem>>, vector<16x128xf32>
      tpu.vector_store %arg20[%c0_97, %c0_98], %256 {strides = array<i32>} : memref<16x128xf32, #tpu.memory_space<vmem>>, vector<16x128xf32>,
    } else {
    }
    %c0 = arith.constant 0 : index
    %c0_1 = arith.constant 0 : index
    %3 = vector.load %arg20[%c0, %c0_1] : memref<16x128xf32, #tpu.memory_space<vmem>>, vector<16x128xf32>
    %4 = arith.truncf %3 : vector<16x128xf32> to vector<16x128xbf16>
    %c0_2 = arith.constant 0 : index
    %c0_3 = arith.constant 0 : index
    %c0_4 = arith.constant 0 : index
    %5 = vector.load %arg4[%c0_2, %c0_3, %c0_4] : memref<1x128x384xbf16, #tpu.memory_space<vmem>>, vector<1x128x384xbf16>
    %6 = vector.shape_cast %5 : vector<1x128x384xbf16> to vector<128x384xbf16>
    %cst = arith.constant dense<0.000000e+00> : vector<16x384xf32>
    %7 = tpu.matmul %4, %6, %cst {dimension_numbers = #tpu.dot_dimension_numbers<[1], [0], [0], [1], [0, 0, 1, 1], [], []>} : vector<16x128xbf16>, vector<128x384xbf16>, vector<16x384xf32> -> vector<16x384xf32>
    %c0_5 = arith.constant 0 : index
    %c0_6 = arith.constant 0 : index
    %c0_7 = arith.constant 0 : index
    %8 = vector.load %arg5[%c0_5, %c0_6, %c0_7] : memref<1x1x384xf32, #tpu.memory_space<vmem>>, vector<1x1x384xf32>
    %9 = vector.shape_cast %8 : vector<1x1x384xf32> to vector<1x384xf32>
    %10 = vector.broadcast %9 : vector<1x384xf32> to vector<16x384xf32>
    %11 = arith.addf %7, %10 : vector<16x384xf32>
    %12 = vector.extract_strided_slice %11 {offsets = [0, 0], sizes = [16, 128], strides = [1, 1]} : vector<16x384xf32> to vector<16x128xf32>
    %13 = arith.truncf %12 : vector<16x128xf32> to vector<16x128xbf16>
    %14 = vector.extract_strided_slice %11 {offsets = [0, 128], sizes = [16, 128], strides = [1, 1]} : vector<16x384xf32> to vector<16x128xf32>
    %15 = arith.truncf %14 : vector<16x128xf32> to vector<16x128xbf16>
    %16 = vector.extract_strided_slice %11 {offsets = [0, 256], sizes = [16, 128], strides = [1, 1]} : vector<16x384xf32> to vector<16x128xf32>
    %17 = arith.truncf %16 : vector<16x128xf32> to vector<16x128xbf16>
    %c0_8 = arith.constant 0 : index
    %c0_9 = arith.constant 0 : index
    %c0_10 = arith.constant 0 : index
    %18 = vector.load %arg6[%c0_8, %c0_9, %c0_10] : memref<1x128x128xbf16, #tpu.memory_space<vmem>>, vector<1x128x128xbf16>
    %19 = vector.shape_cast %18 : vector<1x128x128xbf16> to vector<128x128xbf16>
    %20 = vector.extract_strided_slice %13 {offsets = [0, 0], sizes = [8, 64], strides = [1, 1]} : vector<16x128xbf16> to vector<8x64xbf16>
    %21 = vector.extract_strided_slice %15 {offsets = [0, 0], sizes = [8, 64], strides = [1, 1]} : vector<16x128xbf16> to vector<8x64xbf16>
    %22 = vector.extract_strided_slice %17 {offsets = [0, 0], sizes = [8, 64], strides = [1, 1]} : vector<16x128xbf16> to vector<8x64xbf16>
    %cst_11 = arith.constant dense<0.000000e+00> : vector<8x8xf32>
    %23 = tpu.matmul %20, %21, %cst_11 {dimension_numbers = #tpu.dot_dimension_numbers<[1], [1], [0], [0], [0, 0, 1, 0], [], []>} : vector<8x64xbf16>, vector<8x64xbf16>, vector<8x8xf32> -> vector<8x8xf32>
    %cst_12 = arith.constant 1.250000e-01 : f32
    %24 = vector.broadcast %cst_12 : f32 to vector<8x8xf32>
    %25 = arith.mulf %23, %24 : vector<8x8xf32>
    %cst_13 = arith.constant dense<0xFF800000> : vector<8xf32>
    %26 = vector.multi_reduction <maximumf>, %25, %cst_13 [1] : vector<8x8xf32> to vector<8xf32>
    %27 = vector.shape_cast %26 : vector<8xf32> to vector<8x1xf32>
    %28 = vector.broadcast %27 : vector<8x1xf32> to vector<8x8xf32>
    %29 = arith.subf %25, %28 : vector<8x8xf32>
    %30 = math.exp %29 : vector<8x8xf32>
    %cst_14 = arith.constant dense<0.000000e+00> : vector<8xf32>
    %31 = vector.multi_reduction <add>, %30, %cst_14 [1] : vector<8x8xf32> to vector<8xf32>
    %32 = vector.shape_cast %31 : vector<8xf32> to vector<8x1xf32>
    %33 = tpu.reciprocal %32 {approx = true} : vector<8x1xf32> -> vector<8x1xf32>
    %34 = vector.broadcast %33 : vector<8x1xf32> to vector<8x8xf32>
    %35 = arith.mulf %30, %34 : vector<8x8xf32>
    %36 = vector.extract_strided_slice %35 {offsets = [0, 0], sizes = [1, 8], strides = [1, 1]} : vector<8x8xf32> to vector<1x8xf32>
    %37 = vector.extract_strided_slice %35 {offsets = [1, 0], sizes = [1, 8], strides = [1, 1]} : vector<8x8xf32> to vector<1x8xf32>
    %38 = vector.extract_strided_slice %35 {offsets = [2, 0], sizes = [1, 8], strides = [1, 1]} : vector<8x8xf32> to vector<1x8xf32>
    %39 = vector.extract_strided_slice %35 {offsets = [3, 0], sizes = [1, 8], strides = [1, 1]} : vector<8x8xf32> to vector<1x8xf32>
    %40 = vector.extract_strided_slice %35 {offsets = [4, 0], sizes = [1, 8], strides = [1, 1]} : vector<8x8xf32> to vector<1x8xf32>
    %41 = vector.extract_strided_slice %35 {offsets = [5, 0], sizes = [1, 8], strides = [1, 1]} : vector<8x8xf32> to vector<1x8xf32>
    %42 = vector.extract_strided_slice %35 {offsets = [6, 0], sizes = [1, 8], strides = [1, 1]} : vector<8x8xf32> to vector<1x8xf32>
    %43 = vector.extract_strided_slice %35 {offsets = [7, 0], sizes = [1, 8], strides = [1, 1]} : vector<8x8xf32> to vector<1x8xf32>
    %44 = arith.truncf %35 : vector<8x8xf32> to vector<8x8xbf16>
    %cst_15 = arith.constant dense<0.000000e+00> : vector<8x64xf32>
    %45 = tpu.matmul %44, %22, %cst_15 {dimension_numbers = #tpu.dot_dimension_numbers<[1], [0], [0], [1], [0, 0, 1, 1], [], []>} : vector<8x8xbf16>, vector<8x64xbf16>, vector<8x64xf32> -> vector<8x64xf32>
    %46 = arith.truncf %45 : vector<8x64xf32> to vector<8x64xbf16>
    %47 = vector.extract_strided_slice %19 {offsets = [0, 0], sizes = [64, 128], strides = [1, 1]} : vector<128x128xbf16> to vector<64x128xbf16>
    %cst_16 = arith.constant dense<0.000000e+00> : vector<8x128xf32>
    %48 = tpu.matmul %46, %47, %cst_16 {dimension_numbers = #tpu.dot_dimension_numbers<[1], [0], [0], [1], [0, 0, 1, 1], [], []>} : vector<8x64xbf16>, vector<64x128xbf16>, vector<8x128xf32> -> vector<8x128xf32>
    %49 = vector.extract_strided_slice %13 {offsets = [0, 64], sizes = [8, 64], strides = [1, 1]} : vector<16x128xbf16> to vector<8x64xbf16>
    %50 = vector.extract_strided_slice %15 {offsets = [0, 64], sizes = [8, 64], strides = [1, 1]} : vector<16x128xbf16> to vector<8x64xbf16>
    %51 = vector.extract_strided_slice %17 {offsets = [0, 64], sizes = [8, 64], strides = [1, 1]} : vector<16x128xbf16> to vector<8x64xbf16>
    %cst_17 = arith.constant dense<0.000000e+00> : vector<8x8xf32>
    %52 = tpu.matmul %49, %50, %cst_17 {dimension_numbers = #tpu.dot_dimension_numbers<[1], [1], [0], [0], [0, 0, 1, 0], [], []>} : vector<8x64xbf16>, vector<8x64xbf16>, vector<8x8xf32> -> vector<8x8xf32>
    %cst_18 = arith.constant 1.250000e-01 : f32
    %53 = vector.broadcast %cst_18 : f32 to vector<8x8xf32>
    %54 = arith.mulf %52, %53 : vector<8x8xf32>
    %cst_19 = arith.constant dense<0xFF800000> : vector<8xf32>
    %55 = vector.multi_reduction <maximumf>, %54, %cst_19 [1] : vector<8x8xf32> to vector<8xf32>
    %56 = vector.shape_cast %55 : vector<8xf32> to vector<8x1xf32>
    %57 = vector.broadcast %56 : vector<8x1xf32> to vector<8x8xf32>
    %58 = arith.subf %54, %57 : vector<8x8xf32>
    %59 = math.exp %58 : vector<8x8xf32>
    %cst_20 = arith.constant dense<0.000000e+00> : vector<8xf32>
    %60 = vector.multi_reduction <add>, %59, %cst_20 [1] : vector<8x8xf32> to vector<8xf32>
    %61 = vector.shape_cast %60 : vector<8xf32> to vector<8x1xf32>
    %62 = tpu.reciprocal %61 {approx = true} : vector<8x1xf32> -> vector<8x1xf32>
    %63 = vector.broadcast %62 : vector<8x1xf32> to vector<8x8xf32>
    %64 = arith.mulf %59, %63 : vector<8x8xf32>
    %65 = vector.extract_strided_slice %64 {offsets = [0, 0], sizes = [1, 8], strides = [1, 1]} : vector<8x8xf32> to vector<1x8xf32>
    %66 = vector.extract_strided_slice %64 {offsets = [1, 0], sizes = [1, 8], strides = [1, 1]} : vector<8x8xf32> to vector<1x8xf32>
    %67 = vector.extract_strided_slice %64 {offsets = [2, 0], sizes = [1, 8], strides = [1, 1]} : vector<8x8xf32> to vector<1x8xf32>
    %68 = vector.extract_strided_slice %64 {offsets = [3, 0], sizes = [1, 8], strides = [1, 1]} : vector<8x8xf32> to vector<1x8xf32>
    %69 = vector.extract_strided_slice %64 {offsets = [4, 0], sizes = [1, 8], strides = [1, 1]} : vector<8x8xf32> to vector<1x8xf32>
    %70 = vector.extract_strided_slice %64 {offsets = [5, 0], sizes = [1, 8], strides = [1, 1]} : vector<8x8xf32> to vector<1x8xf32>
    %71 = vector.extract_strided_slice %64 {offsets = [6, 0], sizes = [1, 8], strides = [1, 1]} : vector<8x8xf32> to vector<1x8xf32>
    %72 = vector.extract_strided_slice %64 {offsets = [7, 0], sizes = [1, 8], strides = [1, 1]} : vector<8x8xf32> to vector<1x8xf32>
    %73 = arith.truncf %64 : vector<8x8xf32> to vector<8x8xbf16>
    %cst_21 = arith.constant dense<0.000000e+00> : vector<8x64xf32>
    %74 = tpu.matmul %73, %51, %cst_21 {dimension_numbers = #tpu.dot_dimension_numbers<[1], [0], [0], [1], [0, 0, 1, 1], [], []>} : vector<8x8xbf16>, vector<8x64xbf16>, vector<8x64xf32> -> vector<8x64xf32>
    %75 = arith.truncf %74 : vector<8x64xf32> to vector<8x64xbf16>
    %76 = vector.extract_strided_slice %19 {offsets = [64, 0], sizes = [64, 128], strides = [1, 1]} : vector<128x128xbf16> to vector<64x128xbf16>
    %cst_22 = arith.constant dense<0.000000e+00> : vector<8x128xf32>
    %77 = tpu.matmul %75, %76, %cst_22 {dimension_numbers = #tpu.dot_dimension_numbers<[1], [0], [0], [1], [0, 0, 1, 1], [], []>} : vector<8x64xbf16>, vector<64x128xbf16>, vector<8x128xf32> -> vector<8x128xf32>
    %78 = arith.addf %48, %77 : vector<8x128xf32>
    %79 = tpu.concatenate %36, %37, %38, %39, %40, %41, %42, %43, %65, %66, %67, %68, %69, %70, %71, %72 in 1 : vector<1x8xf32>, vector<1x8xf32>, vector<1x8xf32>, vector<1x8xf32>, vector<1x8xf32>, vector<1x8xf32>, vector<1x8xf32>, vector<1x8xf32>, vector<1x8xf32>, vector<1x8xf32>, vector<1x8xf32>, vector<1x8xf32>, vector<1x8xf32>, vector<1x8xf32>, vector<1x8xf32>, vector<1x8xf32> -> vector<1x128xf32>
    %c0_23 = arith.constant 0 : index
    %c0_24 = arith.constant 0 : index
    %c0_25 = arith.constant 0 : index
    %80 = vector.load %arg19[%c0_23, %c0_24, %c0_25] : memref<1x2x128xf32, #tpu.memory_space<vmem>>, vector<1x1x128xf32>
    %81 = vector.shape_cast %80 : vector<1x1x128xf32> to vector<1x128xf32>
    %82 = vector.shape_cast %79 : vector<1x128xf32> to vector<1x1x128xf32>
    tpu.vector_store %arg19[%c0_23, %c0_24, %c0_25], %82 {strides = array<i32>} : memref<1x2x128xf32, #tpu.memory_space<vmem>>, vector<1x1x128xf32>,
    %83 = vector.extract_strided_slice %13 {offsets = [8, 0], sizes = [8, 64], strides = [1, 1]} : vector<16x128xbf16> to vector<8x64xbf16>
    %84 = vector.extract_strided_slice %15 {offsets = [8, 0], sizes = [8, 64], strides = [1, 1]} : vector<16x128xbf16> to vector<8x64xbf16>
    %85 = vector.extract_strided_slice %17 {offsets = [8, 0], sizes = [8, 64], strides = [1, 1]} : vector<16x128xbf16> to vector<8x64xbf16>
    %cst_26 = arith.constant dense<0.000000e+00> : vector<8x8xf32>
    %86 = tpu.matmul %83, %84, %cst_26 {dimension_numbers = #tpu.dot_dimension_numbers<[1], [1], [0], [0], [0, 0, 1, 0], [], []>} : vector<8x64xbf16>, vector<8x64xbf16>, vector<8x8xf32> -> vector<8x8xf32>
    %cst_27 = arith.constant 1.250000e-01 : f32
    %87 = vector.broadcast %cst_27 : f32 to vector<8x8xf32>
    %88 = arith.mulf %86, %87 : vector<8x8xf32>
    %cst_28 = arith.constant dense<0xFF800000> : vector<8xf32>
    %89 = vector.multi_reduction <maximumf>, %88, %cst_28 [1] : vector<8x8xf32> to vector<8xf32>
    %90 = vector.shape_cast %89 : vector<8xf32> to vector<8x1xf32>
    %91 = vector.broadcast %90 : vector<8x1xf32> to vector<8x8xf32>
    %92 = arith.subf %88, %91 : vector<8x8xf32>
    %93 = math.exp %92 : vector<8x8xf32>
    %cst_29 = arith.constant dense<0.000000e+00> : vector<8xf32>
    %94 = vector.multi_reduction <add>, %93, %cst_29 [1] : vector<8x8xf32> to vector<8xf32>
    %95 = vector.shape_cast %94 : vector<8xf32> to vector<8x1xf32>
    %96 = tpu.reciprocal %95 {approx = true} : vector<8x1xf32> -> vector<8x1xf32>
    %97 = vector.broadcast %96 : vector<8x1xf32> to vector<8x8xf32>
    %98 = arith.mulf %93, %97 : vector<8x8xf32>
    %99 = vector.extract_strided_slice %98 {offsets = [0, 0], sizes = [1, 8], strides = [1, 1]} : vector<8x8xf32> to vector<1x8xf32>
    %100 = vector.extract_strided_slice %98 {offsets = [1, 0], sizes = [1, 8], strides = [1, 1]} : vector<8x8xf32> to vector<1x8xf32>
    %101 = vector.extract_strided_slice %98 {offsets = [2, 0], sizes = [1, 8], strides = [1, 1]} : vector<8x8xf32> to vector<1x8xf32>
    %102 = vector.extract_strided_slice %98 {offsets = [3, 0], sizes = [1, 8], strides = [1, 1]} : vector<8x8xf32> to vector<1x8xf32>
    %103 = vector.extract_strided_slice %98 {offsets = [4, 0], sizes = [1, 8], strides = [1, 1]} : vector<8x8xf32> to vector<1x8xf32>
    %104 = vector.extract_strided_slice %98 {offsets = [5, 0], sizes = [1, 8], strides = [1, 1]} : vector<8x8xf32> to vector<1x8xf32>
    %105 = vector.extract_strided_slice %98 {offsets = [6, 0], sizes = [1, 8], strides = [1, 1]} : vector<8x8xf32> to vector<1x8xf32>
    %106 = vector.extract_strided_slice %98 {offsets = [7, 0], sizes = [1, 8], strides = [1, 1]} : vector<8x8xf32> to vector<1x8xf32>
    %107 = arith.truncf %98 : vector<8x8xf32> to vector<8x8xbf16>
    %cst_30 = arith.constant dense<0.000000e+00> : vector<8x64xf32>
    %108 = tpu.matmul %107, %85, %cst_30 {dimension_numbers = #tpu.dot_dimension_numbers<[1], [0], [0], [1], [0, 0, 1, 1], [], []>} : vector<8x8xbf16>, vector<8x64xbf16>, vector<8x64xf32> -> vector<8x64xf32>
    %109 = arith.truncf %108 : vector<8x64xf32> to vector<8x64xbf16>
    %110 = vector.extract_strided_slice %19 {offsets = [0, 0], sizes = [64, 128], strides = [1, 1]} : vector<128x128xbf16> to vector<64x128xbf16>
    %cst_31 = arith.constant dense<0.000000e+00> : vector<8x128xf32>
    %111 = tpu.matmul %109, %110, %cst_31 {dimension_numbers = #tpu.dot_dimension_numbers<[1], [0], [0], [1], [0, 0, 1, 1], [], []>} : vector<8x64xbf16>, vector<64x128xbf16>, vector<8x128xf32> -> vector<8x128xf32>
    %112 = vector.extract_strided_slice %13 {offsets = [8, 64], sizes = [8, 64], strides = [1, 1]} : vector<16x128xbf16> to vector<8x64xbf16>
    %113 = vector.extract_strided_slice %15 {offsets = [8, 64], sizes = [8, 64], strides = [1, 1]} : vector<16x128xbf16> to vector<8x64xbf16>
    %114 = vector.extract_strided_slice %17 {offsets = [8, 64], sizes = [8, 64], strides = [1, 1]} : vector<16x128xbf16> to vector<8x64xbf16>
    %cst_32 = arith.constant dense<0.000000e+00> : vector<8x8xf32>
    %115 = tpu.matmul %112, %113, %cst_32 {dimension_numbers = #tpu.dot_dimension_numbers<[1], [1], [0], [0], [0, 0, 1, 0], [], []>} : vector<8x64xbf16>, vector<8x64xbf16>, vector<8x8xf32> -> vector<8x8xf32>
    %cst_33 = arith.constant 1.250000e-01 : f32
    %116 = vector.broadcast %cst_33 : f32 to vector<8x8xf32>
    %117 = arith.mulf %115, %116 : vector<8x8xf32>
    %cst_34 = arith.constant dense<0xFF800000> : vector<8xf32>
    %118 = vector.multi_reduction <maximumf>, %117, %cst_34 [1] : vector<8x8xf32> to vector<8xf32>
    %119 = vector.shape_cast %118 : vector<8xf32> to vector<8x1xf32>
    %120 = vector.broadcast %119 : vector<8x1xf32> to vector<8x8xf32>
    %121 = arith.subf %117, %120 : vector<8x8xf32>
    %122 = math.exp %121 : vector<8x8xf32>
    %cst_35 = arith.constant dense<0.000000e+00> : vector<8xf32>
    %123 = vector.multi_reduction <add>, %122, %cst_35 [1] : vector<8x8xf32> to vector<8xf32>
    %124 = vector.shape_cast %123 : vector<8xf32> to vector<8x1xf32>
    %125 = tpu.reciprocal %124 {approx = true} : vector<8x1xf32> -> vector<8x1xf32>
    %126 = vector.broadcast %125 : vector<8x1xf32> to vector<8x8xf32>
    %127 = arith.mulf %122, %126 : vector<8x8xf32>
    %128 = vector.extract_strided_slice %127 {offsets = [0, 0], sizes = [1, 8], strides = [1, 1]} : vector<8x8xf32> to vector<1x8xf32>
    %129 = vector.extract_strided_slice %127 {offsets = [1, 0], sizes = [1, 8], strides = [1, 1]} : vector<8x8xf32> to vector<1x8xf32>
    %130 = vector.extract_strided_slice %127 {offsets = [2, 0], sizes = [1, 8], strides = [1, 1]} : vector<8x8xf32> to vector<1x8xf32>
    %131 = vector.extract_strided_slice %127 {offsets = [3, 0], sizes = [1, 8], strides = [1, 1]} : vector<8x8xf32> to vector<1x8xf32>
    %132 = vector.extract_strided_slice %127 {offsets = [4, 0], sizes = [1, 8], strides = [1, 1]} : vector<8x8xf32> to vector<1x8xf32>
    %133 = vector.extract_strided_slice %127 {offsets = [5, 0], sizes = [1, 8], strides = [1, 1]} : vector<8x8xf32> to vector<1x8xf32>
    %134 = vector.extract_strided_slice %127 {offsets = [6, 0], sizes = [1, 8], strides = [1, 1]} : vector<8x8xf32> to vector<1x8xf32>
    %135 = vector.extract_strided_slice %127 {offsets = [7, 0], sizes = [1, 8], strides = [1, 1]} : vector<8x8xf32> to vector<1x8xf32>
    %136 = arith.truncf %127 : vector<8x8xf32> to vector<8x8xbf16>
    %cst_36 = arith.constant dense<0.000000e+00> : vector<8x64xf32>
    %137 = tpu.matmul %136, %114, %cst_36 {dimension_numbers = #tpu.dot_dimension_numbers<[1], [0], [0], [1], [0, 0, 1, 1], [], []>} : vector<8x8xbf16>, vector<8x64xbf16>, vector<8x64xf32> -> vector<8x64xf32>
    %138 = arith.truncf %137 : vector<8x64xf32> to vector<8x64xbf16>
    %139 = vector.extract_strided_slice %19 {offsets = [64, 0], sizes = [64, 128], strides = [1, 1]} : vector<128x128xbf16> to vector<64x128xbf16>
    %cst_37 = arith.constant dense<0.000000e+00> : vector<8x128xf32>
    %140 = tpu.matmul %138, %139, %cst_37 {dimension_numbers = #tpu.dot_dimension_numbers<[1], [0], [0], [1], [0, 0, 1, 1], [], []>} : vector<8x64xbf16>, vector<64x128xbf16>, vector<8x128xf32> -> vector<8x128xf32>
    %141 = arith.addf %111, %140 : vector<8x128xf32>
    %142 = tpu.concatenate %99, %100, %101, %102, %103, %104, %105, %106, %128, %129, %130, %131, %132, %133, %134, %135 in 1 : vector<1x8xf32>, vector<1x8xf32>, vector<1x8xf32>, vector<1x8xf32>, vector<1x8xf32>, vector<1x8xf32>, vector<1x8xf32>, vector<1x8xf32>, vector<1x8xf32>, vector<1x8xf32>, vector<1x8xf32>, vector<1x8xf32>, vector<1x8xf32>, vector<1x8xf32>, vector<1x8xf32>, vector<1x8xf32> -> vector<1x128xf32>
    %c0_38 = arith.constant 0 : index
    %c1 = arith.constant 1 : index
    %c0_39 = arith.constant 0 : index
    %143 = vector.load %arg19[%c0_38, %c1, %c0_39] : memref<1x2x128xf32, #tpu.memory_space<vmem>>, vector<1x1x128xf32>
    %144 = vector.shape_cast %143 : vector<1x1x128xf32> to vector<1x128xf32>
    %145 = vector.shape_cast %142 : vector<1x128xf32> to vector<1x1x128xf32>
    tpu.vector_store %arg19[%c0_38, %c1, %c0_39], %145 {strides = array<i32>} : memref<1x2x128xf32, #tpu.memory_space<vmem>>, vector<1x1x128xf32>,
    %146 = tpu.concatenate %78, %141 in 0 : vector<8x128xf32>, vector<8x128xf32> -> vector<16x128xf32>
    %c0_40 = arith.constant 0 : index
    %c0_41 = arith.constant 0 : index
    %c0_42 = arith.constant 0 : index
    %147 = vector.load %arg7[%c0_40, %c0_41, %c0_42] : memref<1x1x128xf32, #tpu.memory_space<vmem>>, vector<1x1x128xf32>
    %148 = vector.shape_cast %147 : vector<1x1x128xf32> to vector<1x128xf32>
    %149 = vector.broadcast %148 : vector<1x128xf32> to vector<16x128xf32>
    %150 = arith.addf %146, %149 : vector<16x128xf32>
    %151 = arith.addf %150, %3 : vector<16x128xf32>
    %c0_43 = arith.constant 0 : index
    %c0_44 = arith.constant 0 : index
    %c0_45 = arith.constant 0 : index
    %152 = vector.load %arg8[%c0_43, %c0_44, %c0_45] : memref<1x1x128xf32, #tpu.memory_space<vmem>>, vector<1x1x128xf32>
    %153 = vector.shape_cast %152 : vector<1x1x128xf32> to vector<1x128xf32>
    %c0_46 = arith.constant 0 : index
    %c0_47 = arith.constant 0 : index
    %c0_48 = arith.constant 0 : index
    %154 = vector.load %arg9[%c0_46, %c0_47, %c0_48] : memref<1x1x128xf32, #tpu.memory_space<vmem>>, vector<1x1x128xf32>
    %155 = vector.shape_cast %154 : vector<1x1x128xf32> to vector<1x128xf32>
    %cst_49 = arith.constant dense<0.000000e+00> : vector<16xf32>
    %156 = vector.multi_reduction <add>, %151, %cst_49 [1] : vector<16x128xf32> to vector<16xf32>
    %157 = vector.shape_cast %156 : vector<16xf32> to vector<16x1xf32>
    %cst_50 = arith.constant 1.280000e+02 : f32
    %158 = vector.broadcast %cst_50 : f32 to vector<16x1xf32>
    %159 = arith.divf %157, %158 : vector<16x1xf32>
    %160 = vector.broadcast %159 : vector<16x1xf32> to vector<16x128xf32>
    %161 = arith.subf %151, %160 : vector<16x128xf32>
    %162 = arith.mulf %161, %161 : vector<16x128xf32>
    %cst_51 = arith.constant dense<0.000000e+00> : vector<16xf32>
    %163 = vector.multi_reduction <add>, %162, %cst_51 [1] : vector<16x128xf32> to vector<16xf32>
    %164 = vector.shape_cast %163 : vector<16xf32> to vector<16x1xf32>
    %cst_52 = arith.constant 1.280000e+02 : f32
    %165 = vector.broadcast %cst_52 : f32 to vector<16x1xf32>
    %166 = arith.divf %164, %165 : vector<16x1xf32>
    %cst_53 = arith.constant 9.99999996E-13 : f32
    %167 = vector.broadcast %cst_53 : f32 to vector<16x1xf32>
    %168 = arith.addf %166, %167 : vector<16x1xf32>
    %169 = math.rsqrt %168 : vector<16x1xf32>
    %170 = vector.broadcast %169 : vector<16x1xf32> to vector<16x128xf32>
    %171 = arith.mulf %161, %170 : vector<16x128xf32>
    %172 = vector.broadcast %153 : vector<1x128xf32> to vector<16x128xf32>
    %173 = arith.mulf %171, %172 : vector<16x128xf32>
    %174 = vector.broadcast %155 : vector<1x128xf32> to vector<16x128xf32>
    %175 = arith.addf %173, %174 : vector<16x128xf32>
    %176 = arith.truncf %175 : vector<16x128xf32> to vector<16x128xbf16>
    %c0_54 = arith.constant 0 : index
    %c0_55 = arith.constant 0 : index
    %c0_56 = arith.constant 0 : index
    %177 = vector.load %arg10[%c0_54, %c0_55, %c0_56] : memref<1x128x512xbf16, #tpu.memory_space<vmem>>, vector<1x128x512xbf16>
    %178 = vector.shape_cast %177 : vector<1x128x512xbf16> to vector<128x512xbf16>
    %cst_57 = arith.constant dense<0.000000e+00> : vector<16x512xf32>
    %179 = tpu.matmul %176, %178, %cst_57 {dimension_numbers = #tpu.dot_dimension_numbers<[1], [0], [0], [1], [0, 0, 1, 1], [], []>} : vector<16x128xbf16>, vector<128x512xbf16>, vector<16x512xf32> -> vector<16x512xf32>
    %c0_58 = arith.constant 0 : index
    %c0_59 = arith.constant 0 : index
    %c0_60 = arith.constant 0 : index
    %180 = vector.load %arg11[%c0_58, %c0_59, %c0_60] : memref<1x1x512xf32, #tpu.memory_space<vmem>>, vector<1x1x512xf32>
    %181 = vector.shape_cast %180 : vector<1x1x512xf32> to vector<1x512xf32>
    %182 = vector.broadcast %181 : vector<1x512xf32> to vector<16x512xf32>
    %183 = arith.addf %179, %182 : vector<16x512xf32>
    %cst_61 = arith.constant 5.000000e-01 : f32
    %184 = vector.broadcast %cst_61 : f32 to vector<16x512xf32>
    %185 = arith.mulf %184, %183 : vector<16x512xf32>
    %cst_62 = arith.constant 4.471500e-02 : f32
    %186 = vector.broadcast %cst_62 : f32 to vector<16x512xf32>
    %187 = arith.mulf %186, %183 : vector<16x512xf32>
    %188 = arith.mulf %187, %183 : vector<16x512xf32>
    %189 = arith.mulf %188, %183 : vector<16x512xf32>
    %190 = arith.addf %183, %189 : vector<16x512xf32>
    %cst_63 = arith.constant 0.797884583 : f32
    %191 = vector.broadcast %cst_63 : f32 to vector<16x512xf32>
    %192 = arith.mulf %191, %190 : vector<16x512xf32>
    %193 = math.tanh %192 : vector<16x512xf32>
    %cst_64 = arith.constant 1.000000e+00 : f32
    %194 = vector.broadcast %cst_64 : f32 to vector<16x512xf32>
    %195 = arith.addf %194, %193 : vector<16x512xf32>
    %196 = arith.mulf %185, %195 : vector<16x512xf32>
    %197 = arith.truncf %196 : vector<16x512xf32> to vector<16x512xbf16>
    %c0_65 = arith.constant 0 : index
    %c0_66 = arith.constant 0 : index
    %c0_67 = arith.constant 0 : index
    %198 = vector.load %arg12[%c0_65, %c0_66, %c0_67] : memref<1x512x128xbf16, #tpu.memory_space<vmem>>, vector<1x512x128xbf16>
    %199 = vector.shape_cast %198 : vector<1x512x128xbf16> to vector<512x128xbf16>
    %cst_68 = arith.constant dense<0.000000e+00> : vector<16x128xf32>
    %200 = tpu.matmul %197, %199, %cst_68 {dimension_numbers = #tpu.dot_dimension_numbers<[1], [0], [0], [1], [0, 0, 1, 1], [], []>} : vector<16x512xbf16>, vector<512x128xbf16>, vector<16x128xf32> -> vector<16x128xf32>
    %c0_69 = arith.constant 0 : index
    %c0_70 = arith.constant 0 : index
    %c0_71 = arith.constant 0 : index
    %201 = vector.load %arg13[%c0_69, %c0_70, %c0_71] : memref<1x1x128xf32, #tpu.memory_space<vmem>>, vector<1x1x128xf32>
    %202 = vector.shape_cast %201 : vector<1x1x128xf32> to vector<1x128xf32>
    %203 = vector.broadcast %202 : vector<1x128xf32> to vector<16x128xf32>
    %204 = arith.addf %200, %203 : vector<16x128xf32>
    %205 = arith.addf %204, %175 : vector<16x128xf32>
    %c0_72 = arith.constant 0 : index
    %c0_73 = arith.constant 0 : index
    %c0_74 = arith.constant 0 : index
    %206 = vector.load %arg14[%c0_72, %c0_73, %c0_74] : memref<1x1x128xf32, #tpu.memory_space<vmem>>, vector<1x1x128xf32>
    %207 = vector.shape_cast %206 : vector<1x1x128xf32> to vector<1x128xf32>
    %c0_75 = arith.constant 0 : index
    %c0_76 = arith.constant 0 : index
    %c0_77 = arith.constant 0 : index
    %208 = vector.load %arg15[%c0_75, %c0_76, %c0_77] : memref<1x1x128xf32, #tpu.memory_space<vmem>>, vector<1x1x128xf32>
    %209 = vector.shape_cast %208 : vector<1x1x128xf32> to vector<1x128xf32>
    %cst_78 = arith.constant dense<0.000000e+00> : vector<16xf32>
    %210 = vector.multi_reduction <add>, %205, %cst_78 [1] : vector<16x128xf32> to vector<16xf32>
    %211 = vector.shape_cast %210 : vector<16xf32> to vector<16x1xf32>
    %cst_79 = arith.constant 1.280000e+02 : f32
    %212 = vector.broadcast %cst_79 : f32 to vector<16x1xf32>
    %213 = arith.divf %211, %212 : vector<16x1xf32>
    %214 = vector.broadcast %213 : vector<16x1xf32> to vector<16x128xf32>
    %215 = arith.subf %205, %214 : vector<16x128xf32>
    %216 = arith.mulf %215, %215 : vector<16x128xf32>
    %cst_80 = arith.constant dense<0.000000e+00> : vector<16xf32>
    %217 = vector.multi_reduction <add>, %216, %cst_80 [1] : vector<16x128xf32> to vector<16xf32>
    %218 = vector.shape_cast %217 : vector<16xf32> to vector<16x1xf32>
    %cst_81 = arith.constant 1.280000e+02 : f32
    %219 = vector.broadcast %cst_81 : f32 to vector<16x1xf32>
    %220 = arith.divf %218, %219 : vector<16x1xf32>
    %cst_82 = arith.constant 9.99999996E-13 : f32
    %221 = vector.broadcast %cst_82 : f32 to vector<16x1xf32>
    %222 = arith.addf %220, %221 : vector<16x1xf32>
    %223 = math.rsqrt %222 : vector<16x1xf32>
    %224 = vector.broadcast %223 : vector<16x1xf32> to vector<16x128xf32>
    %225 = arith.mulf %215, %224 : vector<16x128xf32>
    %226 = vector.broadcast %207 : vector<1x128xf32> to vector<16x128xf32>
    %227 = arith.mulf %225, %226 : vector<16x128xf32>
    %228 = vector.broadcast %209 : vector<1x128xf32> to vector<16x128xf32>
    %229 = arith.addf %227, %228 : vector<16x128xf32>
    %c0_83 = arith.constant 0 : index
    %c0_84 = arith.constant 0 : index
    %230 = vector.load %arg20[%c0_83, %c0_84] : memref<16x128xf32, #tpu.memory_space<vmem>>, vector<16x128xf32>
    tpu.vector_store %arg20[%c0_83, %c0_84], %229 {strides = array<i32>} : memref<16x128xf32, #tpu.memory_space<vmem>>, vector<16x128xf32>,
    %c1_i32 = arith.constant 1 : i32
    %231 = arith.cmpi eq, %arg0, %c1_i32 : i32
    %232 = arith.extui %231 : i1 to i32
    %c0_i32_85 = arith.constant 0 : i32
    %233 = arith.cmpi ne, %232, %c0_i32_85 : i32
    scf.if %233 {
      %234 = vector.extract_strided_slice %229 {offsets = [0, 0], sizes = [1, 128], strides = [1, 1]} : vector<16x128xf32> to vector<1x128xf32>
      %c0_86 = arith.constant 0 : index
      %c0_87 = arith.constant 0 : index
      %235 = vector.load %arg16[%c0_86, %c0_87] : memref<8x128xf32, #tpu.memory_space<vmem>>, vector<8x128xf32>
      %cst_88 = arith.constant dense<0.000000e+00> : vector<1x8xf32>
      %236 = tpu.matmul %234, %235, %cst_88 {dimension_numbers = #tpu.dot_dimension_numbers<[1], [1], [0], [0], [0, 0, 1, 0], [], []>} : vector<1x128xf32>, vector<8x128xf32>, vector<1x8xf32> -> vector<1x8xf32>
      %c0_89 = arith.constant 0 : index
      %c0_90 = arith.constant 0 : index
      %237 = vector.load %arg17[%c0_89, %c0_90] : memref<1x8xf32, #tpu.memory_space<vmem>>, vector<1x8xf32>
      %238 = arith.addf %236, %237 : vector<1x8xf32>
      %c0_91 = arith.constant 0 : index
      %c0_92 = arith.constant 0 : index
      %239 = vector.load %arg18[%c0_91, %c0_92] : memref<2x8xf32, #tpu.memory_space<vmem>>, vector<1x8xf32>
      tpu.vector_store %arg18[%c0_91, %c0_92], %238 {strides = array<i32>} : memref<2x8xf32, #tpu.memory_space<vmem>>, vector<1x8xf32>,
      %240 = vector.extract_strided_slice %229 {offsets = [8, 0], sizes = [1, 128], strides = [1, 1]} : vector<16x128xf32> to vector<1x128xf32>
      %c0_93 = arith.constant 0 : index
      %c0_94 = arith.constant 0 : index
      %241 = vector.load %arg16[%c0_93, %c0_94] : memref<8x128xf32, #tpu.memory_space<vmem>>, vector<8x128xf32>
      %cst_95 = arith.constant dense<0.000000e+00> : vector<1x8xf32>
      %242 = tpu.matmul %240, %241, %cst_95 {dimension_numbers = #tpu.dot_dimension_numbers<[1], [1], [0], [0], [0, 0, 1, 0], [], []>} : vector<1x128xf32>, vector<8x128xf32>, vector<1x8xf32> -> vector<1x8xf32>
      %c0_96 = arith.constant 0 : index
      %c0_97 = arith.constant 0 : index
      %243 = vector.load %arg17[%c0_96, %c0_97] : memref<1x8xf32, #tpu.memory_space<vmem>>, vector<1x8xf32>
      %244 = arith.addf %242, %243 : vector<1x8xf32>
      %c1_98 = arith.constant 1 : index
      %c0_99 = arith.constant 0 : index
      %245 = vector.load %arg18[%c1_98, %c0_99] : memref<2x8xf32, #tpu.memory_space<vmem>>, vector<1x8xf32>
      tpu.vector_store %arg18[%c1_98, %c0_99], %244 {strides = array<i32>} : memref<2x8xf32, #tpu.memory_space<vmem>>, vector<1x8xf32>,
    } else {
    }
    return
  }
  func.func @transform_0(%arg0: i32) -> (i32, i32) {
    %c0_i32 = arith.constant 0 : i32
    %c0_i32_0 = arith.constant 0 : i32
    %c0_i32_1 = arith.constant 0 : i32
    return %c0_i32, %c0_i32_0 : i32, i32
  }
  func.func @transform_1(%arg0: i32) -> (i32, i32) {
    %c0_i32 = arith.constant 0 : i32
    %c0_i32_0 = arith.constant 0 : i32
    %c0_i32_1 = arith.constant 0 : i32
    return %c0_i32, %c0_i32_0 : i32, i32
  }
  func.func @transform_2(%arg0: i32) -> (i32, i32) {
    %c0_i32 = arith.constant 0 : i32
    %c0_i32_0 = arith.constant 0 : i32
    %c0_i32_1 = arith.constant 0 : i32
    return %c0_i32, %c0_i32_0 : i32, i32
  }
  func.func @transform_3(%arg0: i32) -> (i32, i32, i32) {
    %c0_i32 = arith.constant 0 : i32
    %c0_i32_0 = arith.constant 0 : i32
    %c0_i32_1 = arith.constant 0 : i32
    return %arg0, %c0_i32, %c0_i32_0 : i32, i32, i32
  }
  func.func @transform_4(%arg0: i32) -> (i32, i32, i32) {
    %c0_i32 = arith.constant 0 : i32
    %c0_i32_0 = arith.constant 0 : i32
    %c0_i32_1 = arith.constant 0 : i32
    return %arg0, %c0_i32, %c0_i32_0 : i32, i32, i32
  }
  func.func @transform_5(%arg0: i32) -> (i32, i32, i32) {
    %c0_i32 = arith.constant 0 : i32
    %c0_i32_0 = arith.constant 0 : i32
    %c0_i32_1 = arith.constant 0 : i32
    return %arg0, %c0_i32, %c0_i32_0 : i32, i32, i32
  }
  func.func @transform_6(%arg0: i32) -> (i32, i32, i32) {
    %c0_i32 = arith.constant 0 : i32
    %c0_i32_0 = arith.constant 0 : i32
    %c0_i32_1 = arith.constant 0 : i32
    return %arg0, %c0_i32, %c0_i32_0 : i32, i32, i32
  }
  func.func @transform_7(%arg0: i32) -> (i32, i32, i32) {
    %c0_i32 = arith.constant 0 : i32
    %c0_i32_0 = arith.constant 0 : i32
    %c0_i32_1 = arith.constant 0 : i32
    return %arg0, %c0_i32, %c0_i32_0 : i32, i32, i32
  }
  func.func @transform_8(%arg0: i32) -> (i32, i32, i32) {
    %c0_i32 = arith.constant 0 : i32
    %c0_i32_0 = arith.constant 0 : i32
    %c0_i32_1 = arith.constant 0 : i32
    return %arg0, %c0_i32, %c0_i32_0 : i32, i32, i32
  }
  func.func @transform_9(%arg0: i32) -> (i32, i32, i32) {
    %c0_i32 = arith.constant 0 : i32
    %c0_i32_0 = arith.constant 0 : i32
    %c0_i32_1 = arith.constant 0 : i32
    return %arg0, %c0_i32, %c0_i32_0 : i32, i32, i32
  }
  func.func @transform_10(%arg0: i32) -> (i32, i32, i32) {
    %c0_i32 = arith.constant 0 : i32
    %c0_i32_0 = arith.constant 0 : i32
    %c0_i32_1 = arith.constant 0 : i32
    return %arg0, %c0_i32, %c0_i32_0 : i32, i32, i32
  }
  func.func @transform_11(%arg0: i32) -> (i32, i32, i32) {
    %c0_i32 = arith.constant 0 : i32
    %c0_i32_0 = arith.constant 0 : i32
    %c0_i32_1 = arith.constant 0 : i32
    return %arg0, %c0_i32, %c0_i32_0 : i32, i32, i32
  }
  func.func @transform_12(%arg0: i32) -> (i32, i32, i32) {
    %c0_i32 = arith.constant 0 : i32
    %c0_i32_0 = arith.constant 0 : i32
    %c0_i32_1 = arith.constant 0 : i32
    return %arg0, %c0_i32, %c0_i32_0 : i32, i32, i32
  }
  func.func @transform_13(%arg0: i32) -> (i32, i32, i32) {
    %c0_i32 = arith.constant 0 : i32
    %c0_i32_0 = arith.constant 0 : i32
    %c0_i32_1 = arith.constant 0 : i32
    return %arg0, %c0_i32, %c0_i32_0 : i32, i32, i32
  }
  func.func @transform_14(%arg0: i32) -> (i32, i32, i32) {
    %c0_i32 = arith.constant 0 : i32
    %c0_i32_0 = arith.constant 0 : i32
    %c0_i32_1 = arith.constant 0 : i32
    return %arg0, %c0_i32, %c0_i32_0 : i32, i32, i32
  }
  func.func @transform_15(%arg0: i32) -> (i32, i32) {
    %c0_i32 = arith.constant 0 : i32
    %c0_i32_0 = arith.constant 0 : i32
    %c0_i32_1 = arith.constant 0 : i32
    return %c0_i32, %c0_i32_0 : i32, i32
  }
  func.func @transform_16(%arg0: i32) -> (i32, i32) {
    %c0_i32 = arith.constant 0 : i32
    %c0_i32_0 = arith.constant 0 : i32
    %c0_i32_1 = arith.constant 0 : i32
    return %c0_i32, %c0_i32_0 : i32, i32
  }
  func.func @transform_17(%arg0: i32) -> (i32, i32) {
    %c0_i32 = arith.constant 0 : i32
    %c0_i32_0 = arith.constant 0 : i32
    %c0_i32_1 = arith.constant 0 : i32
    return %c0_i32, %c0_i32_0 : i32, i32
  }
  func.func @transform_18(%arg0: i32) -> (i32, i32, i32) {
    %c0_i32 = arith.constant 0 : i32
    %c0_i32_0 = arith.constant 0 : i32
    %c0_i32_1 = arith.constant 0 : i32
    return %arg0, %c0_i32, %c0_i32_0 : i32, i32, i32
  }
}

</mosaic_0001>

<bundles_post_ra>
// kernel: squeeze.4
= control target key start
LH: loop header
LB: loop body
LE: loop exit
PB: predicated region body
PF: predicated region fallthrough
CT: control target
= control target key end

     0   :  { %s197_s0 = inlined_call_operand.vmem [shape: f32[1,2,128], index: 0, kind: input, shape index: {}]   ;;  %s198_s1 = inlined_call_operand.hbm [shape: f32[2,2,8,8], index: 1, kind: output, shape index: {}]  }
   0x1   :  { %v6_v0 = vld [vmem:[%s197_s0] sm:$0x3] }
   0x2   :  { %7 = vst [vmem:[#allocation2] sm:$0x3] %v6_v0 }
   0x3   :  { %2 = vsyncpa [#allocation1], 0  ;;  %s149_s0 = smov 120   ;;  %s150_s8 = smov 104   ;;  %vm9_vm0 = vcmask 64512  }
   0x4   :  { %s151_s9 = smov 112   ;;  %s152_s10 = smov 96  }
   0x5   :  { %s153_s11 = smov 88   ;;  %s154_s12 = smov 80  }
   0x6   :  { %s155_s13 = smov 72   ;;  %s156_s14 = smov 64  }
   0x7   :  { %s157_s15 = smov 56   ;;  %s158_s16 = smov 48  }
   0x8   :  { %s159_s17 = smov 40   ;;  %s160_s18 = smov 32  }
   0x9   :  { %v11_v1 = vld [vmem:[#allocation2] sm:$0x3]   ;;  %s161_s19 = smov 24   ;;  %s162_s20 = smov 16  }
   0xa   :  { %v23_v2 = vld [vmem:[#allocation2] sm:$0x3]   ;;  %12 = vrot.lane.b32.xlu0 %v11_v1, %s149_s0  ;;  %s163_s21 = smov 8   ;;  %s164_s22 = smov [#allocation0]  }
   0xb   :  { %24 = vrot.lane.b32.xlu1 %v23_v2, %s150_s8  ;;  %v17_v3 = vld [vmem:[#allocation2] sm:$0x3]   ;;  %s105_s23 = sshll.u32 %s164_s22, 4  ;;  %s106_s23 = int_to_ptr.vmem [resolvable:$true] %s105_s23 }
   0xc   :  { %v29_v4 = vld [vmem:[#allocation2] sm:$0x3]   ;;  %s127_s24 = scalar_lea.vmem %s106_s23, 512  ;;  %p132_p1 = scmp.lt.s32.totalorder %s106_s23, %s106_s23 }
   0xd   :  { %v35_v5 = vld [vmem:[#allocation2] sm:$0x3]   ;;  %p128_p0 = scmp.ne.s32.totalorder %s106_s23, %s127_s24  ;;  %p133_p2 = scmp.lt.s32.totalorder %s127_s24, %s127_s24 }
   0xe   :  { %18 = vrot.lane.b32.xlu0 %v17_v3, %s151_s9  ;;  %v41_v6 = vld [vmem:[#allocation2] sm:$0x3]  }
   0xf   :  { %30 = vrot.lane.b32.xlu1 %v29_v4, %s152_s10  ;;  %v47_v7 = vld [vmem:[#allocation2] sm:$0x3]   ;;  %p134_p3 = por %p133_p2, %p132_p1 }
  0x10   :  { %v53_v8 = vld [vmem:[#allocation2] sm:$0x3]  }
  0x11   :  { %v59_v9 = vld [vmem:[#allocation2] sm:$0x3]   ;;  %p135_p4 = pnand %p134_p3, %p128_p0 }
  0x12   :  { %36 = vrot.lane.b32.xlu0 %v35_v5, %s153_s11  ;;  %v65_v10 = vld [vmem:[#allocation2] sm:$0x3]  }
  0x13   :  { %42 = vrot.lane.b32.xlu1 %v41_v6, %s154_s12  ;;  %v8_v11 = vld [vmem:[#allocation2] sm:$0x3]  }
  0x14   :  { %10 = vst.msk [vmem:[#allocation0] ss:$16 sm:$0x3] %vm9_vm0, %v8_v11   ;;  %v71_v12 = vld [vmem:[#allocation2] sm:$0x3]  }
  0x15   :  { %v77_v13 = vld [vmem:[#allocation2] sm:$0x3]  }
  0x16   :  { %48 = vrot.lane.b32.xlu0 %v47_v7, %s155_s13  ;;  %v83_v14 = vld [vmem:[#allocation2] sm:$0x3]  }
  0x17   :  { %54 = vrot.lane.b32.xlu1 %v53_v8, %s156_s14  ;;  %v89_v15 = vld [vmem:[#allocation2] sm:$0x3]  }
  0x18   :  { %v95_v16 = vld [vmem:[#allocation2] sm:$0x3]  }
  0x1a   :  { %60 = vrot.lane.b32.xlu0 %v59_v9, %s157_s15 }
  0x1b   :  { %66 = vrot.lane.b32.xlu1 %v65_v10, %s158_s16 }
  0x1e   :  { %72 = vrot.lane.b32.xlu0 %v71_v12, %s159_s17 }
  0x1f   :  { %78 = vrot.lane.b32.xlu1 %v77_v13, %s160_s18 }
  0x22   :  { %84 = vrot.lane.b32.xlu0 %v83_v14, %s161_s19 }
  0x23   :  { %90 = vrot.lane.b32.xlu1 %v89_v15, %s162_s20 }
  0x26   :  { %96 = vrot.lane.b32.xlu0 %v95_v16, %s163_s21 }
  0x7c   :  { %v13_v17 = vpop.permute.xlu0 %12  }
  0x7d   :  { %v25_v18 = vpop.permute.xlu1 %24   ;;  %16 = vst.msk [vmem:[#allocation0 + $0x1] ss:$16 sm:$0x3] %vm9_vm0, %v13_v17  }
  0x7e   :  { %28 = vst.msk [vmem:[#allocation0 + $0x3] ss:$16 sm:$0x3] %vm9_vm0, %v25_v18  }
  0x80   :  { %v19_v19 = vpop.permute.xlu0 %18  }
  0x81   :  { %v31_v20 = vpop.permute.xlu1 %30   ;;  %22 = vst.msk [vmem:[#allocation0 + $0x2] ss:$16 sm:$0x3] %vm9_vm0, %v19_v19  }
  0x82   :  { %34 = vst.msk [vmem:[#allocation0 + $0x4] ss:$16 sm:$0x3] %vm9_vm0, %v31_v20  }
  0x84   :  { %v37_v21 = vpop.permute.xlu0 %36  }
  0x85   :  { %v43_v22 = vpop.permute.xlu1 %42   ;;  %40 = vst.msk [vmem:[#allocation0 + $0x5] ss:$16 sm:$0x3] %vm9_vm0, %v37_v21  }
  0x86   :  { %46 = vst.msk [vmem:[#allocation0 + $0x6] ss:$16 sm:$0x3] %vm9_vm0, %v43_v22  }
  0x88   :  { %v49_v23 = vpop.permute.xlu0 %48  }
  0x89   :  { %v55_v24 = vpop.permute.xlu1 %54   ;;  %52 = vst.msk [vmem:[#allocation0 + $0x7] ss:$16 sm:$0x3] %vm9_vm0, %v49_v23  }
  0x8a   :  { %58 = vst.msk [vmem:[#allocation0 + $0x8] ss:$16 sm:$0x3] %vm9_vm0, %v55_v24  }
  0x8c   :  { %v61_v25 = vpop.permute.xlu0 %60  }
  0x8d   :  { %v67_v26 = vpop.permute.xlu1 %66   ;;  %64 = vst.msk [vmem:[#allocation0 + $0x9] ss:$16 sm:$0x3] %vm9_vm0, %v61_v25  }
  0x8e   :  { %70 = vst.msk [vmem:[#allocation0 + $0xa] ss:$16 sm:$0x3] %vm9_vm0, %v67_v26  }
  0x90   :  { %v73_v27 = vpop.permute.xlu0 %72  }
  0x91   :  { %v79_v28 = vpop.permute.xlu1 %78   ;;  %76 = vst.msk [vmem:[#allocation0 + $0xb] ss:$16 sm:$0x3] %vm9_vm0, %v73_v27  }
  0x92   :  { %82 = vst.msk [vmem:[#allocation0 + $0xc] ss:$16 sm:$0x3] %vm9_vm0, %v79_v28  }
  0x94   :  { %v85_v29 = vpop.permute.xlu0 %84  }
  0x95   :  { %v91_v30 = vpop.permute.xlu1 %90   ;;  %88 = vst.msk [vmem:[#allocation0 + $0xd] ss:$16 sm:$0x3] %vm9_vm0, %v85_v29  }
  0x96   :  { %94 = vst.msk [vmem:[#allocation0 + $0xe] ss:$16 sm:$0x3] %vm9_vm0, %v91_v30  }
  0x98   :  { %v97_v31 = vpop.permute.xlu0 %96  }
  0x99   :  { %100 = vst.msk [vmem:[#allocation0 + $0xf] ss:$16 sm:$0x3] %vm9_vm0, %v97_v31  }
  0x9a   :  { %138 = shalt.err (!%p135_p4)
}
  0x9b   :  { %108 = dma.vmem_to_hbm [thread:$0]  %s106_s23, 512, %s198_s1, [#allocation1]  }
  0x9c   :  { %147 = dma.done.wait [#allocation1], 512  }
  0x9d   :  { %148 = vsyncadd [#allocation1], 4294966784 }
  0x9e   :  { %110 = vsyncpa [#allocation1], 1 }

// kernel: bert_classifier_forward.1
= control target key start
LH: loop header
LB: loop body
LE: loop exit
PB: predicated region body
PF: predicated region fallthrough
CT: control target
= control target key end

     0   :  { %s4803_s0 = inlined_call_operand.vmem [shape: f32[16,128], index: 0, kind: input, shape index: {}]   ;;  %s4804_s1 = inlined_call_operand.vmem [shape: f32[1,128], index: 1, kind: input, shape index: {}]   ;;  %s4805_s2 = inlined_call_operand.vmem [shape: f32[1,128], index: 2, kind: input, shape index: {}]   ;;  %s4806_s3 = inlined_call_operand.hbm [shape: bf16[2,128,384], index: 3, kind: input, shape index: {}]   ;;  %s4807_s4 = inlined_call_operand.vmem [shape: f32[2,1,384], index: 4, kind: input, shape index: {}]   ;;  %s4808_s5 = inlined_call_operand.vmem [shape: bf16[2,128,128], index: 5, kind: input, shape index: {}]   ;;  %s4809_s6 = inlined_call_operand.vmem [shape: f32[2,1,128], index: 6, kind: input, shape index: {}]   ;;  %s4810_s7 = inlined_call_operand.vmem [shape: f32[2,1,128], index: 7, kind: input, shape index: {}]   ;;  %s4811_s8 = inlined_call_operand.vmem [shape: f32[2,1,128], index: 8, kind: input, shape index: {}]   ;;  %s4812_s9 = inlined_call_operand.hbm [shape: bf16[2,128,512], index: 9, kind: input, shape index: {}]   ;;  %s4813_s10 = inlined_call_operand.vmem [shape: f32[2,1,512], index: 10, kind: input, shape index: {}]   ;;  %s4814_s11 = inlined_call_operand.hbm [shape: bf16[2,512,128], index: 11, kind: input, shape index: {}]   ;;  %s4815_s12 = inlined_call_operand.vmem [shape: f32[2,1,128], index: 12, kind: input, shape index: {}]   ;;  %s4816_s13 = inlined_call_operand.vmem [shape: f32[2,1,128], index: 13, kind: input, shape index: {}]   ;;  %s4817_s14 = inlined_call_operand.vmem [shape: f32[2,1,128], index: 14, kind: input, shape index: {}]   ;;  %s4818_s15 = inlined_call_operand.vmem [shape: f32[8,128], index: 15, kind: input, shape index: {}]   ;;  %s4819_s16 = inlined_call_operand.vmem [shape: f32[1,8], index: 16, kind: input, shape index: {}]   ;;  %s4820_s17 = inlined_call_operand.hbm [shape: f32[2,8], index: 17, kind: output, shape index: {0}]   ;;  %s4821_s18 = inlined_call_operand.vmem [shape: f32[2,2,128], index: 18, kind: output, shape index: {1}]  }
   0x1   :  { %4831 = sst [smem:[#allocation17_spill]] %s4803_s0 }
   0x2   :  { %4832 = sst [smem:[#allocation18_spill]] %s4804_s1 }
   0x3   :  { %4833 = sst [smem:[#allocation19_spill]] %s4805_s2 }
   0x4   :  { %4834 = sst [smem:[#allocation20_spill]] %s4806_s3 }
   0x5   :  { %4835 = sst [smem:[#allocation21_spill]] %s4807_s4 }
   0x6   :  { %4836 = sst [smem:[#allocation22_spill]] %s4808_s5 }
   0x7   :  { %4837 = sst [smem:[#allocation23_spill]] %s4811_s8 }
   0x8   :  { %4838 = sst [smem:[#allocation24_spill]] %s4812_s9 }
   0x9   :  { %4839 = sst [smem:[#allocation25_spill]] %s4814_s11 }
   0xa   :  { %4840 = sst [smem:[#allocation26_spill]] %s4816_s13 }
   0xb   :  { %4841 = sst [smem:[#allocation27_spill]] %s4817_s14 }
   0xc   :  { %4842 = sst [smem:[#allocation28_spill]] %s4818_s15 }
   0xd   :  { %4843 = sst [smem:[#allocation29_spill]] %s4819_s16 }
   0xe   :  { %4844 = sst [smem:[#allocation30_spill]] %s4820_s17 }
   0xf   :  { %4845 = sst [smem:[#allocation31_spill]] %s4821_s18 }
  0x10   :  { %24 = vsyncpa [#allocation4], 0 }
  0x11   :  { %26 = vsyncpa [#allocation4 + $0x1], 0 }
  0x12   :  { %27 = vsyncpa [#allocation7], 0 }
  0x13   :  { %29 = vsyncpa [#allocation7 + $0x1], 0 }
  0x14   :  { %30 = vsyncpa [#allocation5], 0  ;;  %s4052_s27 = smov 0   ;;  %s4054_s28 = smov 0  }
  0x15   :  { %s4056_s29 = smov 0   ;;  %s4058_s30 = smov 0  }
  0x16 LB: > { %4846 = sst [smem:[#allocation13_spill]] %s3917_s28  ;;  %s4071_s0 = sadd.s32 4294967295, %s3925_s30   ;;  %s3925_s30 = sphi %s4058_s30, %s4880_s30   ;;  %s3921_s29 = sphi %s4056_s29, %s4883_s29   ;;  %s3917_s28 = sphi %s4054_s28, %s4882_s28   ;;  %s3913_s27 = sphi %s4052_s27, %s4881_s27  }
  0x17   : > { %4847 = sst [smem:[#allocation14_spill]] %s3921_s29  ;;  %s4074_s19 = sadd.s32 1, %s3925_s30  }
  0x18   : > { %4848 = sst [smem:[#allocation15_spill]] %s4074_s19  ;;  %s103_s1 = ssub.s32 %s3925_s30, %s4074_s19 }
  0x19   : > { %s106_s20 = sadd.s32 1, %s3921_s29  ;;  %p104_p0 = scmp.eq.s32.totalorder %s103_s1, 0 }
  0x1a   : > { %p113_p1 = scmp.ne.s32.totalorder %s3921_s29, %s3917_s28  ;;  %p114_p2 = scmp.eq.s32.totalorder %s3925_s30, 0 }
  0x1b   : > { %p119_p3 = scmp.ne.s32.totalorder %s3917_s28, %s3913_s27  ;;  %p120_p5 = scmp.eq.s32.totalorder %s4071_s0, 0 }
  0x1c   : > { %s4084_s21 = scalar_select %p104_p0, %s3921_s29, %s106_s20  }
  0x1d   : > { %p115_p4 = por %p114_p2, %p113_p1  ;;  %p3549_p6 = scmp.lt.s32.totalorder %s3925_s30, 2 }
  0x1e   : > { %4849 = sst [smem:[#allocation16_spill]] %s4084_s21  ;;  %p4088_p7 = por %p120_p5, %p119_p3 }
  0x1f   : > { %s4093_s2 = sand.u32 1, %s3921_s29   ;;  %p4095_p8 = pnand %p3549_p6, %p115_p4 }
  0x20   : > { %s4850_s22 = scalar_select %p4088_p7, 1, 0 }
  0x21   : > { %s587_s24 = sand.u32 1, %s3925_s30   ;;  %s4827_s25 = sshll.u32 %s4093_s2, 8 }
  0x22   : > { %s4828_s26 = sshll.u32 %s3925_s30, 12  ;;  %s591_s27 = scalar_lea.vmem [#allocation6], %s4827_s25 }
  0x23   : > { %s598_s1 = sshll.u32 %s591_s27, 4  ;;  %s4852_s9 = sld [smem:[#allocation24_spill]]  ;;  %s4111_s1 = int_to_ptr.vmem [resolvable:$true] %s598_s1 }
  0x24   : > { %s4113_s29 = scalar_lea.sflag [#allocation7], %s587_s24  ;;  %p4119_p10 = pneg %p4095_p8 }
  0x29   : > { %s4109_s19 = scalar_lea.hbm %s4852_s9, %s4828_s26  ;;  %s3780_s20 = scalar_lea.hbm %s4852_s9, 8192 }
  0x2a   : > { %s3775_s17 = scalar_lea.hbm %s4109_s19, 4096  ;;  %p3781_p13 = scmp.lt.s32.totalorder %s4109_s19, %s4852_s9 }
  0x2b   : > { %p3776_p9 = scmp.ne.s32.totalorder %s4109_s19, %s3775_s17  ;;  %p3782_p0 = scmp.lt.s32.totalorder %s3780_s20, %s3775_s17 }
  0x2d   : > { %p3778_p11 = pnand %p4119_p10, %p3776_p9  ;;  %p3783_p1 = por %p3782_p0, %p3781_p13 }
  0x2f   : > { %p3779_p12 = pneg %p3778_p11 }
  0x31   : > { %p3784_p2 = pnand %p3783_p1, %p3779_p12 }
  0x33   : > { %3787 = shalt.err (!%p3784_p2)
}
  0x34   : > { %s3788_s24 = scalar_lea.vmem %s4111_s1, 4096  ;;  %s3927_s15 = smov [#allocation6]  }
  0x35   : > { %p3789_p3 = scmp.ne.s32.totalorder %s4111_s1, %s3788_s24  ;;  %s3793_s21 = sshll.u32 %s3927_s15, 4  ;;  %s3794_s21 = int_to_ptr.vmem [resolvable:$false] %s3793_s21 }
  0x36   : > { %s3795_s27 = scalar_lea.vmem %s3794_s21, 8192  ;;  %p3796_p6 = scmp.lt.s32.totalorder %s4111_s1, %s3794_s21 }
  0x37   : > { %p3791_p4 = pnand %p3789_p3, %p4119_p10  ;;  %p3797_p9 = scmp.lt.s32.totalorder %s3795_s27, %s3788_s24 }
  0x39   : > { %p3792_p5 = pneg %p3791_p4  ;;  %p3798_p11 = por %p3797_p9, %p3796_p6 }
  0x3b   : > { %p3799_p7 = pnand %p3798_p11, %p3792_p5 }
  0x3d   : > { %3802 = shalt.err (!%p3799_p7)
}
  0x3e   : > { %s3928_s17 = smov 256   ;;  %s3929_s15 = smov 16  }
  0x3f   : > { %3545 = dma.hbm_to_vmem [thread:$0]  (!%p4095_p8), %s4109_s19, 4096, %s4111_s1, %s4113_s29, %s3928_s17, %s3928_s17, %s3929_s15  }
  0x40   : > { %s4854_s25 = sshll.u32 %s3925_s30, 12  ;;  %s4855_s11 = sld [smem:[#allocation25_spill]] }
  0x41   : > { %s4856_s21 = sshll.u32 %s4093_s2, 8  ;;  %p3174_p7 = scmp.ge.s32.totalorder %s3925_s30, 1 }
  0x42   : > { %s619_s27 = scalar_lea.vmem [#allocation8], %s4856_s21  ;;  %p652_p12 = scmp.lt.s32.totalorder %s3925_s30, 3 }
  0x43   : > { %s626_s9 = sshll.u32 %s619_s27, 4  ;;  %s3525_s18 = smul.u32 192, %s4093_s2  ;;  %s4152_s9 = int_to_ptr.vmem [resolvable:$true] %s626_s9 }
  0x44   : > { %p4156_p13 = pnand %p3174_p7, %p652_p12  ;;  %s3526_s19 = smul.u32 3072, %s3925_s30 }
  0x45   : > { %s4858_s3 = sld [smem:[#allocation20_spill]]  ;;  %s534_s20 = scalar_lea.sflag [#allocation4], %s4093_s2 }
  0x46   : > { %s4147_s24 = scalar_lea.hbm %s4855_s11, %s4854_s25  ;;  %s537_s25 = scalar_lea.vmem [#allocation3], %s3525_s18 }
  0x47   : > { %s4857_s14 = scalar_select %p4156_p13, 1, 0 }
  0x48   : > { %s544_s26 = sshll.u32 %s537_s25, 4  ;;  %s4166_s26 = int_to_ptr.vmem [resolvable:$true] %s544_s26 }
  0x4b   : > { %s4164_s15 = scalar_lea.hbm %s4858_s3, %s3526_s19  ;;  %s3808_s13 = scalar_lea.hbm %s4858_s3, 6144 }
  0x4c   : > { %s3803_s21 = scalar_lea.hbm %s4164_s15, 3072  ;;  %p3809_p3 = scmp.lt.s32.totalorder %s4164_s15, %s4858_s3 }
  0x4d   : > { %p3804_p0 = scmp.ne.s32.totalorder %s4164_s15, %s3803_s21  ;;  %p3810_p4 = scmp.lt.s32.totalorder %s3808_s13, %s3803_s21 }
  0x4f   : > { %p3806_p1 = pnand %p3804_p0, %p4119_p10  ;;  %p3811_p5 = por %p3810_p4, %p3809_p3 }
  0x51   : > { %p3807_p2 = pneg %p3806_p1 }
  0x53   : > { %p3812_p6 = pnand %p3811_p5, %p3807_p2 }
  0x55   : > { %3815 = shalt.err (!%p3812_p6)
}
  0x56   : > { %s3816_s18 = scalar_lea.vmem %s4166_s26, 3072  ;;  %s3930_s17 = smov [#allocation3]  }
  0x57   : > { %p3817_p9 = scmp.ne.s32.totalorder %s4166_s26, %s3816_s18  ;;  %s3821_s25 = sshll.u32 %s3930_s17, 4  ;;  %s3822_s25 = int_to_ptr.vmem [resolvable:$false] %s3821_s25 }
  0x58   : > { %s3823_s27 = scalar_lea.vmem %s3822_s25, 6144  ;;  %p3824_p12 = scmp.lt.s32.totalorder %s4166_s26, %s3822_s25 }
  0x59   : > { %p3819_p11 = pnand %p3817_p9, %p4119_p10  ;;  %p3825_p0 = scmp.lt.s32.totalorder %s3823_s27, %s3816_s18 }
  0x5b   : > { %p3820_p7 = pneg %p3819_p11  ;;  %p3826_p1 = por %p3825_p0, %p3824_p12 }
  0x5d   : > { %p3827_p13 = pnand %p3826_p1, %p3820_p7 }
  0x5f   : > { %3830 = shalt.err (!%p3827_p13)
}
  0x60   : > { %s3931_s13 = smov 192   ;;  %s3932_s21 = smov 12  }
  0x61   : > { %3542 = dma.hbm_to_vmem [thread:$0]  (!%p4095_p8), %s4164_s15, 3072, %s4166_s26, %s534_s20, %s3931_s13, %s3931_s13, %s3932_s21  }
  0x62   : > { %s3831_s30 = scalar_lea.hbm %s4147_s24, 4096  ;;  %s3836_s18 = scalar_lea.hbm %s4855_s11, 8192 }
  0x63   : > { %p3832_p2 = scmp.ne.s32.totalorder %s4147_s24, %s3831_s30  ;;  %p3837_p13 = scmp.lt.s32.totalorder %s4147_s24, %s4855_s11 }
  0x64   : > { %p3838_p5 = scmp.lt.s32.totalorder %s3836_s18, %s3831_s30 }
  0x65   : > { %p3834_p3 = pnand %p3832_p2, %p4119_p10 }
  0x66   : > { %p3839_p6 = por %p3838_p5, %p3837_p13 }
  0x67   : > { %p3835_p4 = pneg %p3834_p3 }
  0x69   : > { %p3840_p9 = pnand %p3839_p6, %p3835_p4 }
  0x6b   : > { %3843 = shalt.err (!%p3840_p9)
}
  0x6c   : > { %s3844_s2 = scalar_lea.vmem %s4152_s9, 4096  ;;  %s3933_s15 = smov [#allocation8]  }
  0x6d   : > { %p3845_p11 = scmp.ne.s32.totalorder %s4152_s9, %s3844_s2  ;;  %s3849_s26 = sshll.u32 %s3933_s15, 4  ;;  %s3850_s26 = int_to_ptr.vmem [resolvable:$false] %s3849_s26 }
  0x6e   : > { %s3851_s20 = scalar_lea.vmem %s3850_s26, 8192  ;;  %p3852_p0 = scmp.lt.s32.totalorder %s4152_s9, %s3850_s26 }
  0x6f   : > { %p3847_p7 = pnand %p3845_p11, %p4119_p10  ;;  %p3853_p1 = scmp.lt.s32.totalorder %s3851_s20, %s3844_s2 }
  0x71   : > { %p3848_p12 = pneg %p3847_p7  ;;  %p3854_p2 = por %p3853_p1, %p3852_p0 }
  0x73   : > { %p3855_p3 = pnand %p3854_p2, %p3848_p12 }
  0x75   : > { %3858 = shalt.err (!%p3855_p3)
}
  0x76   : > { %s3934_s27 = smov 64   ;;  %s3935_s13 = smov 4  }
  0x77   : > { %3548 = dma.hbm_to_vmem [thread:$0]  (!%p4095_p8), %s4147_s24, 4096, %s4152_s9, %s4113_s29, %s3934_s27, %s3934_s27, %s3935_s13  }
  0x78   : > { %p4859_p10 = scmp.ne.s32.totalorder %s4857_s14, 0 }
  0x79   : > { %s658_s16 = sand.u32 (!%p4859_p10), 1, %s3917_s28   ;;  %p4860_p4 = scmp.ne.s32.totalorder (!%p4859_p10), %s4850_s22, 0 }
  0x7a   : > { %656 = sbr.rel (%p4859_p10) target bundleno = 3718 (0xe86), region = 88  ;;  %s659_s30 = scalar_lea.sflag (!%p4859_p10), [#allocation4], %s658_s16 }
  0x7b   : > { %s3527_s21 = smul.u32 (!%p4859_p10), 192, %s658_s16 }
  0x7d   : > { %s4215_s1 = scalar_lea.vmem (!%p4859_p10), [#allocation3], %s3527_s21 }
  0x7f   : > { %3900 = dma.done.wait (%p4860_p4), %s659_s30, 3072  }
  0x80   : > { %3902 = vsyncadd (%p4860_p4), %s659_s30, 4294964224  ;;  %s667_s19 = sand.u32 1, %s4071_s0   ;;  %s3175_s23 = sshll.u32 %s658_s16, 8 }
  0x81   : > { %s668_s9 = scalar_lea.sflag [#allocation7], %s667_s19  ;;  %s4222_s29 = scalar_lea.vmem [#allocation6], %s3175_s23 }
  0x82   : > { %3904 = dma.done.wait (%p4860_p4), %s668_s9, 8192  }
  0x83   : > { %3906 = vsyncadd (%p4860_p4), %s668_s9, 4294959104  ;;  %p773_p8 = scmp.lt.s32.totalorder %s4071_s0, 1  ;;  %s4861_s5 = sld [smem:[#allocation22_spill]] }
  0x84   : > { %s4862_s4 = sld [smem:[#allocation21_spill]]  ;;  %p3181_p13 = scmp.ne.s32.totalorder %s4071_s0, 0 }
  0x85   : > { %s4230_s14 = scalar_select %p773_p8, %s4071_s0, 1 }
  0x86   : > { %s4864_s26 = sld [smem:[#allocation26_spill]] }
  0x87   : > { %s3528_s24 = smul.u32 3, %s4230_s14  ;;  %s3305_s18 = sshll.u32 %s4230_s14, 6 }
  0x88   : > { %s3179_s17 = sshll.u32 %s4230_s14, 2  ;;  %s797_s20 = scalar_lea.vmem %s4815_s12, %s4230_s14 }
  0x89   : > { %s4237_s25 = scalar_lea.vmem %s4861_s5, %s3305_s18  ;;  %s4260_s5 = scalar_lea.vmem %s4813_s10, %s3179_s17 }
  0x8a   : > { %s4246_s13 = scalar_lea.vmem %s4862_s4, %s3528_s24  ;;  %s4865_s30 = sld [smem:[#allocation27_spill]] }
  0x8b   : > { %s3180_s19 = sshll.u32 %s4230_s14, 1  ;;  %s4866_s28 = sld [smem:[#allocation31_spill]] }
  0x8c   : > { %s800_s4 = scalar_lea.vmem %s4864_s26, %s4230_s14  ;;  %s4280_s17 = scalar_lea.vmem [#allocation8], %s3175_s23 }
  0x8d   : > { %812 = sbr.rel (%p3181_p13) target bundleno = 459 (0x1cb), region = 104  ;;  %s4867_s2 = sld [smem:[#allocation17_spill]] (!%p3181_p13) }
  0x8e   : > { %s4868_s23 = sld [smem:[#allocation18_spill]] (!%p3181_p13) }
  0x8f   : > { %s4869_s27 = sld [smem:[#allocation19_spill]] (!%p3181_p13) }
  0x90   : > { %s803_s11 = scalar_lea.vmem %s4865_s30, %s4230_s14 }
  0x91   : > { %s4278_s8 = scalar_lea.vmem %s4866_s28, %s3180_s19 }
  0x93   : > { %v813_v0 = vld [vmem:[%s4867_s2] sm:$0xff]  ;;  %v814_v1 = vld [vmem:[%s4867_s2 + $0x8] sm:$0xff] }
  0x94   : > { %817 = vadd.xlane.f32.xlu0 %v813_v0  ;;  %v3182_v17 = vld [vmem:[%s4868_s23] ss:$0 sm:$0xff] }
  0x95   : > { %v3183_v19 = vld [vmem:[%s4869_s27] ss:$0 sm:$0xff] }
  0x98   : > { %819 = vadd.xlane.f32.xlu0 %v814_v1 }
 0x11d   : > { %v818_v2 = vpop.xlane.xlu0 %817 }
 0x11e   : > { %v822_v3 = vmul.f32 0.0078125, %v818_v2 }
 0x120   : > { %v824_v4 = vsub.f32 %v813_v0, %v822_v3 }
 0x121   : > { %v820_v5 = vpop.xlane.xlu0 %819 }
 0x122   : > { %v823_v6 = vmul.f32 0.0078125, %v820_v5  ;;  %v826_v7 = vmul.f32 %v824_v4, %v824_v4 }
 0x124   : > { %v825_v8 = vsub.f32 %v814_v1, %v823_v6  ;;  %828 = vadd.xlane.f32.xlu1 %v826_v7 }
 0x126   : > { %v827_v9 = vmul.f32 %v825_v8, %v825_v8 }
 0x128   : > { %830 = vadd.xlane.f32.xlu1 %v827_v9 }
 0x1ad   : > { %v829_v10 = vpop.xlane.xlu1 %828 }
 0x1ae   : > { %v832_v11 = vmul.f32 0.0078125, %v829_v10 }
 0x1b0   : > { %v834_v12 = vadd.f32 1e-12, %v832_v11 }
 0x1b1   : > { %v831_v13 = vpop.xlane.xlu1 %830 }
 0x1b2   : > { %3611 = vrsqrt.f32 %v834_v12  ;;  %v833_v14 = vmul.f32 0.0078125, %v831_v13 }
 0x1b4   : > { %v835_v15 = vadd.f32 1e-12, %v833_v14 }
 0x1b6   : > { %3613 = vrsqrt.f32 %v835_v15 }
 0x1bf   : > { %v3612_v16 = vpop.eup %3611 }
 0x1c0   : > { %v838_v18 = vmul.f32 %v3612_v16, %v824_v4 }
 0x1c2   : > { %v846_v20 = vmul.f32 %v3182_v17, %v838_v18 }
 0x1c3   : > { %v3614_v21 = vpop.eup %3613 }
 0x1c4   : > { %v854_v22 = vadd.f32 %v3183_v19, %v846_v20  ;;  %v839_v23 = vmul.f32 %v3614_v21, %v825_v8 }
 0x1c6   : > { %856 = vst [vmem:[#allocation2] sm:$0xff] %v854_v22  ;;  %v847_v24 = vmul.f32 %v3182_v17, %v839_v23 }
 0x1c8   : > { %v855_v25 = vadd.f32 %v3183_v19, %v847_v24 }
 0x1ca   : > { %857 = vst [vmem:[#allocation2 + $0x8] sm:$0xff] %v855_v25 }
 0x1cb PF: > { %v3615_v26 = vld [vmem:[%s4215_s1 + $0xac] ss:$12 sps:$4 sm:$0xff]   ;;  %v3617_v27 = vld [vmem:[%s4215_s1 + $0xa8] ss:$12 sps:$4 sm:$0xff]   ;;  %v3936_v28 = vmov 0   ;;  %v3937_v46 = vmov 0.0   ;;  %v895_v47 = vlaneseq  ;;  %s4870_s16 = scalar_lea.vmem %s4809_s6, %s4230_s14  ;;  %s4871_s30 = scalar_lea.vmem %s4810_s7, %s4230_s14 }
 0x1cc   : > { %1070 = vmatprep.mubr.bf16.mxu0 %v3936_v28  ;;  %1038 = vmatprep.subr.bf16.mxu0 %v3615_v26  ;;  %v3618_v29 = vld [vmem:[%s4215_s1 + $0x94] ss:$12 sps:$4 sm:$0xff]   ;;  %v3620_v30 = vld [vmem:[%s4215_s1 + $0x90] ss:$12 sps:$4 sm:$0xff]   ;;  %v3623_v32 = vld [vmem:[%s4215_s1 + $0x78] ss:$12 sps:$4 sm:$0xff]  }
 0x1cd   : > { %1039 = vmatpush1.bf16.msra.mxu0 %v3617_v27  ;;  %v3621_v31 = vld [vmem:[%s4215_s1 + $0x7c] ss:$12 sps:$4 sm:$0xff]   ;;  %v3624_v33 = vld [vmem:[%s4215_s1 + $0x64] ss:$12 sps:$4 sm:$0xff]   ;;  %v3626_v34 = vld [vmem:[%s4215_s1 + $0x60] ss:$12 sps:$4 sm:$0xff]   ;;  %3399 = vmatprep.subr.bf16.mxu1 %v3937_v46 }
 0x1ce   : > { %1040 = vmatprep.subr.bf16.mxu0 %v3618_v29  ;;  %v3627_v35 = vld [vmem:[%s4215_s1 + $0x4c] ss:$12 sps:$4 sm:$0xff]   ;;  %v3629_v36 = vld [vmem:[%s4215_s1 + $0x48] ss:$12 sps:$4 sm:$0xff]   ;;  %v3632_v38 = vld [vmem:[%s4215_s1 + $0x30] ss:$12 sps:$4 sm:$0xff]  }
 0x1cf   : > { %v3630_v37 = vld [vmem:[%s4215_s1 + $0x34] ss:$12 sps:$4 sm:$0xff]   ;;  %v3633_v39 = vld [vmem:[%s4215_s1 + $0x1c] ss:$12 sps:$4 sm:$0xff]   ;;  %v3635_v40 = vld [vmem:[%s4215_s1 + $0x18] ss:$12 sps:$4 sm:$0xff]  }
 0x1d0   : > { %v3636_v41 = vld [vmem:[%s4215_s1 + $0x4] ss:$12 sps:$4 sm:$0xff]   ;;  %v3638_v42 = vld [vmem:[%s4215_s1] ss:$12 sps:$4 sm:$0xff]   ;;  %vm3938_vm0 = vmmov 0   ;;  %v4324_v48 = vshrl.u32 %v895_v47, 7 }
 0x1d1   : > { %1041 = vmatpush1.bf16.msra.mxu0 %v3620_v30  ;;  %v4312_v43 = vld [vmem:[#allocation2] sm:$0xff]  ;;  %v4314_v44 = vld [vmem:[#allocation2 + $0x8] sm:$0xff]  ;;  %3415 = vmatprep.mubr.msk.bf16.mxu1 %vm3938_vm0, %v3937_v46  ;;  %vm1141_vm1 = vcmask 523264   ;;  %v3641_v3 = vld [vmem:[%s4215_s1 + $0x80] ss:$12 sps:$4 sm:$0xff]   ;;  %vm1189_vm2 = vcmask 64512  }
 0x1d2   : > { %1042 = vmatprep.subr.bf16.mxu0 %v3621_v31  ;;  %v860_v45 = vpack.c.bf16 %v4314_v44, %v4312_v43  ;;  %v901_v49 = vsub.s32 1, %v4324_v48  ;;  %v4328_v51 = vld [vmem:[%s4246_s13] sm:$0x7]  ;;  %v897_v53 = vsub.s32 0, %v4324_v48  ;;  %s3939_s13 = smov 64   ;;  %vm1205_vm3 = vcmask 1043456  }
 0x1d3   : > { %v3639_v1 = vld [vmem:[%s4215_s1 + $0xb0] ss:$12 sps:$4 sm:$0xff]   ;;  %v3640_v2 = vld [vmem:[%s4215_s1 + $0x98] ss:$12 sps:$4 sm:$0xff]   ;;  %v3642_v4 = vld [vmem:[%s4215_s1 + $0x68] ss:$12 sps:$4 sm:$0xff]  }
 0x1d4   : > { %v902_v54 = vrot.slane %v4328_v51, %v901_v49  ;;  %v898_v57 = vrot.slane %v4328_v51, %v897_v53  ;;  %3400 = vmatpush3.bf16.msra.mxu1 %v3639_v1  ;;  %v3643_v5 = vld [vmem:[%s4215_s1 + $0x50] ss:$12 sps:$4 sm:$0xff]   ;;  %v3644_v6 = vld [vmem:[%s4215_s1 + $0x38] ss:$12 sps:$4 sm:$0xff]   ;;  %v3645_v7 = vld [vmem:[%s4215_s1 + $0x20] ss:$12 sps:$4 sm:$0xff]  }
 0x1d5   : > { %1043 = vmatpush1.bf16.msra.mxu0 %v3623_v32  ;;  %3401 = vmatprep.subr.bf16.mxu1 %v3937_v46  ;;  %v3646_v8 = vld [vmem:[%s4215_s1 + $0x8] ss:$12 sps:$4 sm:$0xff]   ;;  %s3940_s21 = smov 16   ;;  %s3941_s19 = smov 40   ;;  %vm1561_vm4 = vcmask 130048   ;;  %vm1563_vm5 = vcmask 195584  }
 0x1d6   : > { %1044 = vmatprep.subr.bf16.mxu0 %v3624_v33  ;;  %s3942_s9 = smov 48   ;;  %s3943_s18 = smov 56   ;;  %vm1565_vm6 = vcmask 261120   ;;  %vm1567_vm7 = vcmask 326656   ;;  %vm1569_vm8 = vcmask 392192   ;;  %vm1571_vm9 = vcmask 457728  }
 0x1d7   : > { %s3944_s22 = smov 72   ;;  %s3945_s26 = smov 80   ;;  %vm1574_vm10 = vcmask 588800   ;;  %vm1576_vm11 = vcmask 654336   ;;  %vm1578_vm12 = vcmask 719872   ;;  %vm1580_vm13 = vcmask 785408  }
 0x1d8   : > { %3402 = vmatpush3.bf16.msra.mxu1 %v3640_v2  ;;  %s3946_s15 = smov 88   ;;  %s3947_s3 = smov 96   ;;  %vm1582_vm14 = vcmask 850944   ;;  %vm1584_vm15 = vcmask 916480  }
 0x1d9   : > { %1045 = vmatpush1.bf16.msra.mxu0 %v3626_v34  ;;  %3403 = vmatprep.subr.bf16.mxu1 %v3937_v46  ;;  %v905_v34 = vsub.s32 2, %v4324_v48  ;;  %s3948_s28 = smov 104   ;;  %s4872_s1 = sld [smem:[#allocation23_spill]] }
 0x1da   : > { %1046 = vmatprep.subr.bf16.mxu0 %v3627_v35  ;;  %p3298_p5 = scmp.ne.s32.totalorder %s4071_s0, 1 }
 0x1db   : > { %v906_v35 = vrot.slane %v4328_v51, %v905_v34 }
 0x1dc   : > { %3404 = vmatpush3.bf16.msra.mxu1 %v3641_v3  ;;  %v4425_v3 = vld [vmem:[%s4237_s25 + $0x18] sm:$0xff]  }
 0x1dd   : > { %1047 = vmatpush1.bf16.msra.mxu0 %v3629_v36  ;;  %3405 = vmatprep.subr.bf16.mxu1 %v3937_v46 }
 0x1de   : > { %1048 = vmatprep.subr.bf16.mxu0 %v3630_v37 }
 0x1e0   : > { %3406 = vmatpush3.bf16.msra.mxu1 %v3642_v4 }
 0x1e1   : > { %1049 = vmatpush1.bf16.msra.mxu0 %v3632_v38  ;;  %3407 = vmatprep.subr.bf16.mxu1 %v3937_v46 }
 0x1e2   : > { %1050 = vmatprep.subr.bf16.mxu0 %v3633_v39 }
 0x1e4   : > { %3408 = vmatpush3.bf16.msra.mxu1 %v3643_v5  ;;  %v4432_v5 = vld [vmem:[%s4237_s25 + $0x10] sm:$0xff]  }
 0x1e5   : > { %1051 = vmatpush1.bf16.msra.mxu0 %v3635_v40  ;;  %3409 = vmatprep.subr.bf16.mxu1 %v3937_v46 }
 0x1e6   : > { %1052 = vmatprep.subr.bf16.mxu0 %v3636_v41 }
 0x1e8   : > { %3410 = vmatpush3.bf16.msra.mxu1 %v3644_v6  ;;  %v4439_v6 = vld [vmem:[%s4237_s25 + $0x8] sm:$0xff]  }
 0x1e9   : > { %1053 = vmatpush1.bf16.msra.mxu0 %v3638_v42  ;;  %3411 = vmatprep.subr.bf16.mxu1 %v3937_v46 }
 0x1ea   : > { %3419 = vmatprep.subr.bf16.mxu0 %v3937_v46 }
 0x1ec   : > { %1071 = vmatmul.mubr.bf16.vlgmr.msra.gmra.mxu0 %v860_v45  ;;  %3412 = vmatpush3.bf16.msra.mxu1 %v3645_v7  ;;  %v4444_v7 = vld [vmem:[%s4237_s25] sm:$0xff]  }
 0x1ed   : > { %3421 = vmatprep.mubr.msk.bf16.mxu0 %vm3938_vm0, %v3937_v46  ;;  %3413 = vmatprep.subr.bf16.mxu1 %v3937_v46 }
 0x1f0   : > { %3414 = vmatpush3.bf16.msra.mxu1 %v3646_v8 }
 0x1f1   : > { %3425 = vmatprep.subr.bf16.mxu1 %v3937_v46 }
 0x1f3   : > { %3416 = vmatmul.mubr.bf16.vlgmr.msra.gmra.mxu1 %v860_v45 }
 0x1f4   : > { %3427 = vmatprep.mubr.msk.bf16.mxu1 %vm3938_vm0, %v3937_v46 }
 0x2ac   : > { %v1072_v50 = vpop.f32.mrf.mxu0 }
 0x2ad   : > { %v1073_v62 = vadd.f32 %v1072_v50, %v898_v57 }
 0x2ae   : > { %v1074_v52 = vpop.f32.mrf.mxu0 }
 0x2af   : > { %v1075_v58 = vadd.f32 %v1074_v52, %v902_v54 }
 0x2b0   : > { %v1076_v55 = vpop.f32.mrf.mxu0 }
 0x2b1   : > { %v1077_v60 = vadd.f32 %v1076_v55, %v898_v57  ;;  %v4404_v57 = vld [vmem:[%s4237_s25 + $0x38] sm:$0xff]  }
 0x2b2   : > { %v1078_v56 = vpop.f32.mrf.mxu0 }
 0x2b3   : > { %v1079_v59 = vadd.f32 %v1078_v56, %v902_v54  ;;  %v4343_v0 = vpack.c.bf16 %v1077_v60, %v1073_v62  ;;  %v1115_v27 = vpop.f32.mrf.mxu1  ;;  %v3654_v60 = vld [vmem:[%s4237_s25 + $0x20] sm:$0xff]  }
 0x2b4   : > { %v1116_v36 = vadd.f32 %v1115_v27, %v906_v35 }
 0x2b5   : > { %v4337_v61 = vpack.c.bf16 %v1079_v59, %v1075_v58  ;;  %v3417_v29 = vpop.f32.mrf.mxu1  ;;  %v1589_v52 = vrot.slane %v4343_v0, 4  ;;  %v4408_v58 = vld [vmem:[%s4237_s25 + $0x30] sm:$0xff]   ;;  %v4413_v59 = vld [vmem:[%s4237_s25 + $0x28] sm:$0xff]   ;;  %s4873_s25 = scalar_lea.vmem %s4872_s1, %s4230_s14 }
 0x2b7   : > { %1254 = vrot.lane.b32.xlu0 %v4337_v61, %s3939_s13  ;;  %v1146_v63 = vsel %vm1141_vm1, %v4337_v61, 0  ;;  %v1118_v30 = vpop.f32.mrf.mxu1  ;;  %v1590_v50 = vrot.slane %v4337_v61, 4 }
 0x2b8   : > { %3420 = vmatpush3.bf16.xpose.msra.mxu0 %v1146_v63  ;;  %v1119_v37 = vadd.f32 %v1118_v30, %v906_v35 }
 0x2b9   : > { %3431 = vmatprep.subr.bf16.mxu0 %v3937_v46  ;;  %v3418_v31 = vpop.f32.mrf.mxu1 }
 0x2ba   : > { %v4382_v38 = vpack.c.bf16 %v1119_v37, %v1116_v36 }
 0x2bb   : > { %1251 = vrot.lane.b32.xlu0 %v4343_v0, %s3939_s13 }
 0x2bc   : > { %v1207_v39 = vsel %vm1205_vm3, %v4382_v38, 0  ;;  %v1650_v8 = vrot.slane %v4382_v38, 4 }
 0x2bd   : > { %3426 = vmatpush3.bf16.msra.mxu1 %v1207_v39 }
 0x2be   : > { %3437 = vmatprep.subr.bf16.mxu1 %v3937_v46 }
 0x2bf   : > { %3422 = vmatmul.mubr.msk.bf16.vlgmr.msra.gmra.mxu0 %vm1141_vm1, %v4343_v0 }
 0x2c0   : > { %3433 = vmatprep.mubr.msk.bf16.mxu0 %vm3938_vm0, %v3937_v46 }
 0x329   : > { %v1255_v9 = vpop.permute.xlu0 %1254 }
 0x32a   : > { %v1260_v10 = vsel %vm1141_vm1, %v1255_v9, 0 }
 0x32b   : > { %3432 = vmatpush3.bf16.xpose.msra.mxu0 %v1260_v10 }
 0x32c   : > { %3443 = vmatprep.subr.bf16.mxu0 %v3937_v46 }
 0x32d   : > { %v1252_v11 = vpop.permute.xlu0 %1251 }
 0x332   : > { %3434 = vmatmul.mubr.msk.bf16.vlgmr.msra.gmra.mxu0 %vm1141_vm1, %v1252_v11 }
 0x333   : > { %3451 = vmatprep.mubr.msk.bf16.mxu0 %vm3938_vm0, %v3937_v46  ;;  %3444 = vmatpush3.bf16.msra.mxu0 %v4404_v57 }
 0x334   : > { %3445 = vmatprep.subr.bf16.mxu0 %v3937_v46 }
 0x337   : > { %3446 = vmatpush3.bf16.msra.mxu0 %v4408_v58 }
 0x338   : > { %3447 = vmatprep.subr.bf16.mxu0 %v3937_v46 }
 0x33b   : > { %3448 = vmatpush3.bf16.msra.mxu0 %v4413_v59 }
 0x33c   : > { %3449 = vmatprep.subr.bf16.mxu0 %v3937_v46 }
 0x33f   : > { %3450 = vmatpush3.bf16.msra.mxu0 %v3654_v60 }
 0x340   : > { %3467 = vmatprep.subr.bf16.mxu0 %v3937_v46 }
 0x37f   : > { %v1182_v12 = vpop.f32.mrf.mxu0 }
 0x380   : > { %v1188_v13 = vmul.f32 0.125, %v1182_v12  ;;  %v1655_v12 = vsel %vm1205_vm3, %v1650_v8, 0 }
 0x381   : > { %v3423_v14 = vpop.f32.mrf.mxu0 }
 0x382   : > { %v1190_v15 = vsel %vm1189_vm2, %v1188_v13, -inf }
 0x383   : > { %1191 = vmax.xlane.f32.xlu1 %v1190_v15  ;;  %v1185_v16 = vpop.f32.mrf.mxu0 }
 0x385   : > { %v3424_v17 = vpop.f32.mrf.mxu0 }
 0x3f2   : > { %v1296_v18 = vpop.f32.mrf.mxu0 }
 0x3f3   : > { %v1302_v19 = vmul.f32 0.125, %v1296_v18  ;;  %v1595_v18 = vsel %vm1141_vm1, %v1590_v50, 0 }
 0x3f4   : > { %v3435_v20 = vpop.f32.mrf.mxu0 }
 0x3f5   : > { %v1303_v21 = vsel %vm1189_vm2, %v1302_v19, -inf }
 0x3f6   : > { %1304 = vmax.xlane.f32.xlu1 %v1303_v21  ;;  %v1299_v22 = vpop.f32.mrf.mxu0 }
 0x3f8   : > { %v3436_v23 = vpop.f32.mrf.mxu0 }
 0x40c   : > { %v1192_v24 = vpop.xlane.xlu1 %1191 }
 0x40d   : > { %v1193_v25 = vsub.f32 %v1188_v13, %v1192_v24 }
 0x40f   : > { %v1194_v26 = vmul.f32 1.442695, %v1193_v25 }
 0x411   : > { %3735 = vpow2.f32 %v1194_v26 }
 0x41e   : > { %v3736_v32 = vpop.eup %3735 }
 0x41f   : > { %v1196_v33 = vsel %vm1189_vm2, %v3736_v32, 0.0 }
 0x420   : > { %1197 = vadd.xlane.f32.xlu0 %v1196_v33 }
 0x47f   : > { %v1305_v40 = vpop.xlane.xlu1 %1304 }
 0x480   : > { %v1306_v41 = vsub.f32 %v1302_v19, %v1305_v40 }
 0x482   : > { %v1307_v42 = vmul.f32 1.442695, %v1306_v41 }
 0x484   : > { %3737 = vpow2.f32 %v1307_v42 }
 0x491   : > { %v3738_v45 = vpop.eup %3737 }
 0x492   : > { %v1309_v47 = vsel %vm1189_vm2, %v3738_v45, 0.0 }
 0x493   : > { %1310 = vadd.xlane.f32.xlu1 %v1309_v47 }
 0x4a4   : > { %1316 = vrot.lane.b32.xlu1 %v4382_v38, %s3939_s13 }
 0x4a8   : > { %1700 = vrot.lane.b32.xlu1 %v1590_v50, %s3939_s13 }
 0x4a9   : > { %v1198_v51 = vpop.xlane.xlu0 %1197 }
 0x4aa   : > { %3739 = vrcp.f32 %v1198_v51 }
 0x4ac   : > { %1698 = vrot.lane.b32.xlu1 %v1589_v52, %s3939_s13 }
 0x4b7   : > { %v3740_v54 = vpop.eup %3739 }
 0x4b8   : > { %v4396_v55 = vmul.f32 %v3740_v54, %v3736_v32 }
 0x4ba   : > { %v1201_v56 = vpack.c.bf16 %v4396_v55, %v4396_v55  ;;  %v1516_v38 = vrot.slane %v4396_v55, 5 }
 0x4bc   : > { %3428 = vmatmul.mubr.msk.bf16.vlgmr.msra.gmra.mxu1 %vm1189_vm2, %v1201_v56 }
 0x4bd   : > { %3439 = vmatprep.mubr.msk.bf16.mxu1 %vm3938_vm0, %v3937_v46 }
 0x51c   : > { %v1311_v61 = vpop.xlane.xlu1 %1310 }
 0x51d   : > { %3741 = vrcp.f32 %v1311_v61 }
 0x520   : > { %v1317_v62 = vpop.permute.xlu1 %1316 }
 0x521   : > { %v1322_v63 = vsel %vm1205_vm3, %v1317_v62, 0 }
 0x522   : > { %3438 = vmatpush3.bf16.msra.mxu1 %v1322_v63 }
 0x523   : > { %3455 = vmatprep.subr.bf16.mxu1 %v3937_v46 }
 0x524   : > { %v1701_v21 = vpop.permute.xlu1 %1700 }
 0x525   : > { %v1706_v22 = vsel %vm1141_vm1, %v1701_v21, 0 }
 0x528   : > { %v1699_v23 = vpop.permute.xlu1 %1698 }
 0x52a   : > { %v3742_v1 = vpop.eup %3741 }
 0x52b   : > { %v4422_v2 = vmul.f32 %v3742_v1, %v3738_v45  ;;  %v4490_v1 = vld [vmem:[%s4870_s16] ss:$0 sm:$0xff]  ;;  %s3950_s16 = smov 24  }
 0x52d   : > { %v1314_v4 = vpack.c.bf16 %v4422_v2, %v4422_v2 }
 0x52f   : > { %3440 = vmatmul.mubr.msk.bf16.vlgmr.msra.gmra.mxu1 %vm1189_vm2, %v1314_v4 }
 0x530   : > { %3456 = vmatpush3.bf16.msra.mxu1 %v4425_v3  ;;  %3463 = vmatprep.mubr.msk.bf16.mxu1 %vm3938_vm0, %v3937_v46 }
 0x531   : > { %3457 = vmatprep.subr.bf16.mxu1 %v3937_v46 }
 0x534   : > { %3458 = vmatpush3.bf16.msra.mxu1 %v4432_v5 }
 0x535   : > { %3459 = vmatprep.subr.bf16.mxu1 %v3937_v46 }
 0x538   : > { %3460 = vmatpush3.bf16.msra.mxu1 %v4439_v6 }
 0x539   : > { %3461 = vmatprep.subr.bf16.mxu1 %v3937_v46 }
 0x53c   : > { %3462 = vmatpush3.bf16.msra.mxu1 %v4444_v7 }
 0x53d   : > { %3473 = vmatprep.subr.bf16.mxu1 %v3937_v46 }
 0x57c   : > { %v1243_v9 = vpop.f32.mrf.mxu1 }
 0x57d   : > { %v1249_v10 = vpack.c.bf16 %v1243_v9, %v1243_v9 }
 0x57e   : > { %v3429_v11 = vpop.f32.mrf.mxu1 }
 0x57f   : > { %3464 = vmatmul.mubr.msk.bf16.vlgmr.msra.gmra.mxu1 %vm1141_vm1, %v1249_v10  ;;  %v1504_v10 = vrot.slane %v4396_v55, 2  ;;  %v1532_v11 = vrot.slane %v4422_v2, 1 }
 0x580   : > { %3474 = vmatpush3.bf16.msra.mxu1 %v1655_v12  ;;  %v1246_v13 = vpop.f32.mrf.mxu1  ;;  %3475 = vmatprep.mubr.msk.bf16.mxu1 %vm3938_vm0, %v3937_v46  ;;  %v1536_v12 = vrot.slane %v4422_v2, 2 }
 0x581   : > { %3485 = vmatprep.subr.bf16.mxu1 %v3937_v46  ;;  %v1540_v13 = vrot.slane %v4422_v2, 3 }
 0x582   : > { %v3430_v14 = vpop.f32.mrf.mxu1 }
 0x583   : > { %v1544_v14 = vrot.slane %v4422_v2, 4 }
 0x5ef   : > { %v1358_v15 = vpop.f32.mrf.mxu1 }
 0x5f0   : > { %v1364_v16 = vpack.c.bf16 %v1358_v15, %v1358_v15  ;;  %v1548_v15 = vrot.slane %v4422_v2, 5 }
 0x5f1   : > { %v3441_v17 = vpop.f32.mrf.mxu1 }
 0x5f2   : > { %3452 = vmatmul.mubr.msk.bf16.vlgmr.msra.gmra.mxu0 %vm1141_vm1, %v1364_v16 }
 0x5f3   : > { %3468 = vmatpush3.bf16.xpose.msra.mxu0 %v1595_v18  ;;  %v1361_v19 = vpop.f32.mrf.mxu1  ;;  %3469 = vmatprep.mubr.msk.bf16.mxu0 %vm3938_vm0, %v3937_v46 }
 0x5f4   : > { %3479 = vmatprep.subr.bf16.mxu0 %v3937_v46 }
 0x5f5   : > { %v3442_v20 = vpop.f32.mrf.mxu1 }
 0x5fa   : > { %3470 = vmatmul.mubr.msk.bf16.vlgmr.msra.gmra.mxu0 %vm1141_vm1, %v1589_v52 }
 0x5fb   : > { %3480 = vmatpush3.bf16.xpose.msra.mxu0 %v1706_v22  ;;  %3481 = vmatprep.mubr.msk.bf16.mxu0 %vm3938_vm0, %v3937_v46 }
 0x5fc   : > { %3491 = vmatprep.subr.bf16.mxu0 %v3937_v46 }
 0x602   : > { %3482 = vmatmul.mubr.msk.bf16.vlgmr.msra.gmra.mxu0 %vm1141_vm1, %v1699_v23 }
 0x603   : > { %3492 = vmatpush3.bf16.msra.mxu0 %v4404_v57  ;;  %3499 = vmatprep.mubr.msk.bf16.mxu0 %vm3938_vm0, %v3937_v46 }
 0x604   : > { %3493 = vmatprep.subr.bf16.mxu0 %v3937_v46 }
 0x607   : > { %3494 = vmatpush3.bf16.msra.mxu0 %v4408_v58 }
 0x608   : > { %3495 = vmatprep.subr.bf16.mxu0 %v3937_v46 }
 0x60b   : > { %3496 = vmatpush3.bf16.msra.mxu0 %v4413_v59 }
 0x60c   : > { %3497 = vmatprep.subr.bf16.mxu0 %v3937_v46 }
 0x60f   : > { %3498 = vmatpush3.bf16.msra.mxu0 %v3654_v60 }
 0x63f   : > { %v1493_v0 = vpop.f32.mrf.mxu1 }
 0x641   : > { %v3465_v24 = vpop.f32.mrf.mxu1 }
 0x643   : > { %v1496_v25 = vpop.f32.mrf.mxu1 }
 0x645   : > { %v3466_v26 = vpop.f32.mrf.mxu1 }
 0x6b2   : > { %v1426_v27 = vpop.f32.mrf.mxu0 }
 0x6b3   : > { %v1494_v63 = vadd.f32 %v1493_v0, %v1426_v27 }
 0x6b4   : > { %v3453_v29 = vpop.f32.mrf.mxu0 }
 0x6b5   : > { %v1980_v4 = vadd.f32 %v4490_v1, %v1494_v63 }
 0x6b6   : > { %v1429_v30 = vpop.f32.mrf.mxu0 }
 0x6b7   : > { %v4494_v9 = vadd.f32 %v1980_v4, %v4312_v43  ;;  %v1524_v43 = vrot.slane %v4396_v55, 7  ;;  %v3669_v4 = vld [vmem:[%s4222_s29 + $0xa4] ss:$16 sps:$4 sm:$0xff]  }
 0x6b8   : > { %v3454_v31 = vpop.f32.mrf.mxu0 }
 0x6ba   : > { %v1631_v32 = vpop.f32.mrf.mxu0 }
 0x6bb   : > { %v1637_v33 = vmul.f32 0.125, %v1631_v32 }
 0x6bc   : > { %v3471_v35 = vpop.f32.mrf.mxu0 }
 0x6bd   : > { %v1638_v36 = vsel %vm1189_vm2, %v1637_v33, -inf }
 0x6be   : > { %1639 = vmax.xlane.f32.xlu1 %v1638_v36  ;;  %v1634_v37 = vpop.f32.mrf.mxu0 }
 0x6c0   : > { %v3472_v39 = vpop.f32.mrf.mxu0 }
 0x6c2   : > { %v1742_v40 = vpop.f32.mrf.mxu0 }
 0x6c3   : > { %v1748_v41 = vmul.f32 0.125, %v1742_v40 }
 0x6c4   : > { %v3483_v42 = vpop.f32.mrf.mxu0 }
 0x6c5   : > { %v1749_v45 = vsel %vm1189_vm2, %v1748_v41, -inf }
 0x6c6   : > { %1750 = vmax.xlane.f32.xlu0 %v1749_v45  ;;  %v1745_v47 = vpop.f32.mrf.mxu0 }
 0x6c8   : > { %v3484_v50 = vpop.f32.mrf.mxu0 }
 0x747   : > { %v1640_v51 = vpop.xlane.xlu1 %1639 }
 0x748   : > { %v1641_v52 = vsub.f32 %v1637_v33, %v1640_v51 }
 0x74a   : > { %v1642_v54 = vmul.f32 1.442695, %v1641_v52  ;;  %v3655_v52 = vld [vmem:[%s4222_s29 + $0xe0] ss:$16 sps:$4 sm:$0xff]  }
 0x74c   : > { %3743 = vpow2.f32 %v1642_v54  ;;  %v3657_v54 = vld [vmem:[%s4222_s29 + $0xe4] ss:$16 sps:$4 sm:$0xff]  }
 0x74d   : > { %2240 = vmatprep.subr.bf16.mxu0 %v3657_v54  ;;  %v3707_v54 = vld [vmem:[%s4280_s17 + $0x70] sm:$0xff]  }
 0x74f   : > { %v1751_v56 = vpop.xlane.xlu0 %1750 }
 0x750   : > { %v1752_v57 = vsub.f32 %v1748_v41, %v1751_v56  ;;  %v3658_v56 = vld [vmem:[%s4222_s29 + $0xe8] ss:$16 sps:$4 sm:$0xff]  }
 0x752   : > { %v1753_v58 = vmul.f32 1.442695, %v1752_v57  ;;  %v3660_v57 = vld [vmem:[%s4222_s29 + $0xec] ss:$16 sps:$4 sm:$0xff]  }
 0x754   : > { %3745 = vpow2.f32 %v1753_v58  ;;  %v3663_v58 = vld [vmem:[%s4222_s29 + $0xc4] ss:$16 sps:$4 sm:$0xff]  }
 0x759   : > { %v3744_v59 = vpop.eup %3743 }
 0x75a   : > { %v1644_v60 = vsel %vm1189_vm2, %v3744_v59, 0.0 }
 0x75b   : > { %1645 = vadd.xlane.f32.xlu0 %v1644_v60  ;;  %v3664_v60 = vld [vmem:[%s4222_s29 + $0xc8] ss:$16 sps:$4 sm:$0xff]  }
 0x761   : > { %v3746_v61 = vpop.eup %3745 }
 0x762   : > { %v1755_v62 = vsel %vm1189_vm2, %v3746_v61, 0.0 }
 0x763   : > { %1756 = vadd.xlane.f32.xlu0 %v1755_v62 }
 0x779   : > { %1761 = vrot.lane.b32.xlu0 %v1650_v8, %s3939_s13  ;;  %v1520_v8 = vrot.slane %v4396_v55, 6 }
 0x798   : > { %1986 = vadd.xlane.f32.xlu0 %v4494_v9 }
 0x7ae   : > { %1505 = vrot.lane.b32.xlu0 %v1504_v10, %s3940_s21  ;;  %v3667_v10 = vld [vmem:[%s4222_s29 + $0xa0] ss:$16 sps:$4 sm:$0xff]  }
 0x7b2   : > { %1517 = vrot.lane.b32.xlu0 %v1516_v38, %s3941_s19  ;;  %v3670_v38 = vld [vmem:[%s4222_s29 + $0xa8] ss:$16 sps:$4 sm:$0xff]  }
 0x7b6   : > { %1521 = vrot.lane.b32.xlu0 %v1520_v8, %s3942_s9  ;;  %v3673_v8 = vld [vmem:[%s4222_s29 + $0x80] ss:$16 sps:$4 sm:$0xff]  }
 0x7ba   : > { %1525 = vrot.lane.b32.xlu0 %v1524_v43, %s3943_s18  ;;  %v3675_v43 = vld [vmem:[%s4222_s29 + $0x84] ss:$16 sps:$4 sm:$0xff]  }
 0x7be   : > { %1529 = vrot.lane.b32.xlu0 %v4422_v2, %s3939_s13 }
 0x7c2   : > { %1533 = vrot.lane.b32.xlu0 %v1532_v11, %s3944_s22  ;;  %v3676_v11 = vld [vmem:[%s4222_s29 + $0x88] ss:$16 sps:$4 sm:$0xff]  }
 0x7c6   : > { %1537 = vrot.lane.b32.xlu0 %v1536_v12, %s3945_s26  ;;  %v3678_v12 = vld [vmem:[%s4222_s29 + $0x8c] ss:$16 sps:$4 sm:$0xff]  }
 0x7ca   : > { %1541 = vrot.lane.b32.xlu0 %v1540_v13, %s3946_s15  ;;  %v3681_v13 = vld [vmem:[%s4222_s29 + $0x64] ss:$16 sps:$4 sm:$0xff]  }
 0x7ce   : > { %1545 = vrot.lane.b32.xlu0 %v1544_v14, %s3947_s3  ;;  %v3684_v14 = vld [vmem:[%s4222_s29 + $0x6c] ss:$16 sps:$4 sm:$0xff]  }
 0x7d2   : > { %1549 = vrot.lane.b32.xlu0 %v1548_v15, %s3948_s28  ;;  %v3679_v15 = vld [vmem:[%s4222_s29 + $0x60] ss:$16 sps:$4 sm:$0xff]  }
 0x7e4   : > { %v1646_v16 = vpop.xlane.xlu0 %1645 }
 0x7e5   : > { %3747 = vrcp.f32 %v1646_v16  ;;  %v3682_v16 = vld [vmem:[%s4222_s29 + $0x68] ss:$16 sps:$4 sm:$0xff]  }
 0x7ec   : > { %v1757_v17 = vpop.xlane.xlu0 %1756 }
 0x7ed   : > { %3749 = vrcp.f32 %v1757_v17  ;;  %v3687_v17 = vld [vmem:[%s4222_s29 + $0x44] ss:$16 sps:$4 sm:$0xff]  }
 0x7f0   : > { %v1762_v20 = vpop.permute.xlu0 %1761 }
 0x7f1   : > { %v1767_v22 = vsel %vm1205_vm3, %v1762_v20, 0  ;;  %v3685_v20 = vld [vmem:[%s4222_s29 + $0x40] ss:$16 sps:$4 sm:$0xff]  }
 0x7f2   : > { %v3748_v18 = vpop.eup %3747 }
 0x7f3   : > { %v4517_v19 = vmul.f32 %v3748_v18, %v3744_v59  ;;  %v3666_v59 = vld [vmem:[%s4222_s29 + $0xcc] ss:$16 sps:$4 sm:$0xff]  }
 0x7f4   : > { %v3690_v18 = vld [vmem:[%s4222_s29 + $0x4c] ss:$16 sps:$4 sm:$0xff]  }
 0x7f5   : > { %v1649_v21 = vpack.c.bf16 %v4517_v19, %v4517_v19 }
 0x7f7   : > { %3476 = vmatmul.mubr.msk.bf16.vlgmr.msra.gmra.mxu1 %vm1189_vm2, %v1649_v21  ;;  %v3688_v21 = vld [vmem:[%s4222_s29 + $0x48] ss:$16 sps:$4 sm:$0xff]  }
 0x7f8   : > { %3486 = vmatpush3.bf16.msra.mxu1 %v1767_v22  ;;  %3487 = vmatprep.mubr.msk.bf16.mxu1 %vm3938_vm0, %v3937_v46  ;;  %v3693_v22 = vld [vmem:[%s4222_s29 + $0x24] ss:$16 sps:$4 sm:$0xff]  }
 0x7f9   : > { %3503 = vmatprep.subr.bf16.mxu1 %v3937_v46 }
 0x7fa   : > { %v3750_v23 = vpop.eup %3749 }
 0x7fb   : > { %v4526_v0 = vmul.f32 %v3750_v23, %v3746_v61  ;;  %v3696_v23 = vld [vmem:[%s4222_s29 + $0x2c] ss:$16 sps:$4 sm:$0xff]  }
 0x7fd   : > { %v1760_v24 = vpack.c.bf16 %v4526_v0, %v4526_v0 }
 0x7ff   : > { %3488 = vmatmul.mubr.msk.bf16.vlgmr.msra.gmra.mxu1 %vm1189_vm2, %v1760_v24  ;;  %v3691_v24 = vld [vmem:[%s4222_s29 + $0x20] ss:$16 sps:$4 sm:$0xff]  }
 0x800   : > { %3504 = vmatpush3.bf16.msra.mxu1 %v4425_v3  ;;  %3511 = vmatprep.mubr.msk.bf16.mxu1 %vm3938_vm0, %v3937_v46  ;;  %vm1586_vm0 = vcmask 982016  }
 0x801   : > { %3505 = vmatprep.subr.bf16.mxu1 %v3937_v46 }
 0x804   : > { %3506 = vmatpush3.bf16.msra.mxu1 %v4432_v5 }
 0x805   : > { %3507 = vmatprep.subr.bf16.mxu1 %v3937_v46 }
 0x808   : > { %3508 = vmatpush3.bf16.msra.mxu1 %v4439_v6 }
 0x809   : > { %3509 = vmatprep.subr.bf16.mxu1 %v3937_v46 }
 0x80c   : > { %3510 = vmatpush3.bf16.msra.mxu1 %v4444_v7 }
 0x80d   : > { %2283 = vmatprep.subr.bf16.mxu1 %v3660_v57  ;;  %v3709_v57 = vld [vmem:[%s4280_s17 + $0x30] sm:$0xff]  }
 0x821   : > { %v1987_v35 = vpop.xlane.xlu0 %1986 }
 0x822   : > { %v1991_v39 = vmul.f32 0.0078125, %v1987_v35  ;;  %v3229_v35 = vld [vmem:[%s4871_s30] ss:$0 sm:$0xff] }
 0x8b7   : > { %v1691_v25 = vpop.f32.mrf.mxu1 }
 0x8b8   : > { %v1697_v26 = vpack.c.bf16 %v1691_v25, %v1691_v25  ;;  %v3694_v25 = vld [vmem:[%s4222_s29 + $0x28] ss:$16 sps:$4 sm:$0xff]  }
 0x8b9   : > { %v3477_v27 = vpop.f32.mrf.mxu1 }
 0x8ba   : > { %3512 = vmatmul.mubr.msk.bf16.vlgmr.msra.gmra.mxu1 %vm1141_vm1, %v1697_v26  ;;  %v3699_v26 = vld [vmem:[%s4222_s29 + $0x4] ss:$16 sps:$4 sm:$0xff]   ;;  %v3702_v27 = vld [vmem:[%s4222_s29 + $0xc] ss:$16 sps:$4 sm:$0xff]  }
 0x8bb   : > { %v1694_v3 = vpop.f32.mrf.mxu1  ;;  %2315 = vmatprep.mubr.bf16.mxu1 %v3936_v28  ;;  %2284 = vmatpush1.bf16.msra.mxu1 %v3658_v56  ;;  %v3708_v56 = vld [vmem:[%s4280_s17 + $0xf0] sm:$0xff]  }
 0x8bc   : > { %2285 = vmatprep.subr.bf16.mxu1 %v3666_v59  ;;  %v3697_v3 = vld [vmem:[%s4222_s29] ss:$16 sps:$4 sm:$0xff]   ;;  %v3711_v59 = vld [vmem:[%s4280_s17 + $0x68] sm:$0xff]  }
 0x8bd   : > { %v3478_v29 = vpop.f32.mrf.mxu1 }
 0x8be   : > { %v3700_v29 = vld [vmem:[%s4222_s29 + $0x8] ss:$16 sps:$4 sm:$0xff]  }
 0x8bf   : > { %v1803_v30 = vpop.f32.mrf.mxu1  ;;  %2286 = vmatpush1.bf16.msra.mxu1 %v3664_v60  ;;  %v3713_v60 = vld [vmem:[%s4280_s17 + $0x28] sm:$0xff]  }
 0x8c0   : > { %v1809_v31 = vpack.c.bf16 %v1803_v30, %v1803_v30 }
 0x8c1   : > { %v3489_v5 = vpop.f32.mrf.mxu1 }
 0x8c2   : > { %3500 = vmatmul.mubr.msk.bf16.vlgmr.msra.gmra.mxu0 %vm1141_vm1, %v1809_v31 }
 0x8c3   : > { %v1806_v32 = vpop.f32.mrf.mxu1  ;;  %2272 = vmatprep.mubr.bf16.mxu0 %v3936_v28  ;;  %v4546_v28 = vsub.f32 %v4494_v9, %v1991_v39  ;;  %2241 = vmatpush1.bf16.msra.mxu0 %v3655_v52  ;;  %v3672_v9 = vld [vmem:[%s4222_s29 + $0xac] ss:$16 sps:$4 sm:$0xff]  }
 0x8c4   : > { %2242 = vmatprep.subr.bf16.mxu0 %v3663_v58  ;;  %2287 = vmatprep.subr.bf16.mxu1 %v3672_v9  ;;  %v3706_v52 = vld [vmem:[%s4280_s17 + $0xb8] sm:$0xff]   ;;  %v3710_v58 = vld [vmem:[%s4280_s17 + $0xb0] sm:$0xff]  }
 0x8c5   : > { %v3490_v46 = vpop.f32.mrf.mxu1  ;;  %v1995_v51 = vmul.f32 %v4546_v28, %v4546_v28  ;;  %2288 = vmatpush1.bf16.msra.mxu1 %v3670_v38  ;;  %v3719_v9 = vld [vmem:[%s4280_s17 + $0x58] sm:$0xff]  }
 0x8c6   : > { %2289 = vmatprep.subr.bf16.mxu1 %v3678_v12  ;;  %v3721_v38 = vld [vmem:[%s4280_s17 + $0x18] sm:$0xff]   ;;  %v3725_v12 = vld [vmem:[%s4280_s17 + $0x10] sm:$0xff]  }
 0x8c9   : > { %2290 = vmatpush1.bf16.msra.mxu1 %v3676_v11  ;;  %v3724_v11 = vld [vmem:[%s4280_s17 + $0xd0] sm:$0xff]  }
 0x8ca   : > { %2291 = vmatprep.subr.bf16.mxu1 %v3684_v14  ;;  %v3727_v14 = vld [vmem:[%s4280_s17 + $0x48] sm:$0xff]  }
 0x8cd   : > { %2292 = vmatpush1.bf16.msra.mxu1 %v3682_v16  ;;  %v3729_v16 = vld [vmem:[%s4280_s17 + $0x8] sm:$0xff]  }
 0x8ce   : > { %2293 = vmatprep.subr.bf16.mxu1 %v3690_v18  ;;  %v3731_v18 = vld [vmem:[%s4280_s17 + $0x40] sm:$0xff]  }
 0x8d1   : > { %2294 = vmatpush1.bf16.msra.mxu1 %v3688_v21  ;;  %v3733_v21 = vld [vmem:[%s4280_s17] sm:$0xff]  }
 0x8d2   : > { %2295 = vmatprep.subr.bf16.mxu1 %v3696_v23  ;;  %v2058_v23 = vld [vmem:[%s4260_s5] sm:$0xf] }
 0x8d5   : > { %2296 = vmatpush1.bf16.msra.mxu1 %v3694_v25  ;;  %v2063_v25 = vrot.slane %v2058_v23, %v897_v53 }
 0x8d6   : > { %2297 = vmatprep.subr.bf16.mxu1 %v3702_v27  ;;  %v2067_v27 = vrot.slane %v2058_v23, %v901_v49 }
 0x8d9   : > { %2298 = vmatpush1.bf16.msra.mxu1 %v3700_v29 }
 0x97a   : > { %v1890_v6 = vpop.f32.mrf.mxu1 }
 0x97c   : > { %v3513_v7 = vpop.f32.mrf.mxu1 }
 0x97e   : > { %v1893_v33 = vpop.f32.mrf.mxu1 }
 0x980   : > { %v3514_v36 = vpop.f32.mrf.mxu1 }
 0x982   : > { %v1847_v37 = vpop.f32.mrf.mxu0 }
 0x983   : > { %v1891_v40 = vadd.f32 %v1890_v6, %v1847_v37 }
 0x984   : > { %v3501_v41 = vpop.f32.mrf.mxu0 }
 0x985   : > { %v1981_v42 = vadd.f32 %v4490_v1, %v1891_v40  ;;  %v3230_v40 = vld [vmem:[%s4873_s25] ss:$0 sm:$0xff] }
 0x986   : > { %v1850_v45 = vpop.f32.mrf.mxu0 }
 0x987   : > { %v1983_v47 = vadd.f32 %v1981_v42, %v4314_v44  ;;  %v3661_v44 = vld [vmem:[%s4222_s29 + $0xc0] ss:$16 sps:$4 sm:$0xff]   ;;  %s3951_s29 = smov 32  }
 0x988   : > { %v3502_v50 = vpop.f32.mrf.mxu0  ;;  %2243 = vmatpush1.bf16.msra.mxu0 %v3661_v44  ;;  %v3712_v44 = vld [vmem:[%s4280_s17 + $0xe8] sm:$0xff]  }
 0x989   : > { %1988 = vadd.xlane.f32.xlu1 %v1983_v47  ;;  %2244 = vmatprep.subr.bf16.mxu0 %v3669_v4  ;;  %v3704_v50 = vld [vmem:[%s4280_s17 + $0xf8] sm:$0xff]   ;;  %v3718_v4 = vld [vmem:[%s4280_s17 + $0xa0] sm:$0xff]  }
 0x98a   : > { %3373 = vmatprep.subr.bf16.mxu1 %v3704_v50 }
 0x98c   : > { %2245 = vmatpush1.bf16.msra.mxu0 %v3667_v10  ;;  %v3720_v10 = vld [vmem:[%s4280_s17 + $0xd8] sm:$0xff]  }
 0x98d   : > { %1997 = vadd.xlane.f32.xlu1 %v1995_v51  ;;  %2246 = vmatprep.subr.bf16.mxu0 %v3675_v43  ;;  %v3705_v51 = vld [vmem:[%s4280_s17 + $0x38] sm:$0xff]   ;;  %v3723_v43 = vld [vmem:[%s4280_s17 + $0x50] sm:$0xff]  }
 0x990   : > { %2247 = vmatpush1.bf16.msra.mxu0 %v3673_v8  ;;  %v3722_v8 = vld [vmem:[%s4280_s17 + $0x98] sm:$0xff]  }
 0x991   : > { %2248 = vmatprep.subr.bf16.mxu0 %v3681_v13  ;;  %v3726_v13 = vld [vmem:[%s4280_s17 + $0x90] sm:$0xff]  }
 0x994   : > { %2249 = vmatpush1.bf16.msra.mxu0 %v3679_v15  ;;  %v3728_v15 = vld [vmem:[%s4280_s17 + $0xc8] sm:$0xff]  }
 0x995   : > { %2250 = vmatprep.subr.bf16.mxu0 %v3687_v17  ;;  %v3730_v17 = vld [vmem:[%s4280_s17 + $0x88] sm:$0xff]  }
 0x998   : > { %2251 = vmatpush1.bf16.msra.mxu0 %v3685_v20  ;;  %v3732_v20 = vld [vmem:[%s4280_s17 + $0xc0] sm:$0xff]  }
 0x999   : > { %2252 = vmatprep.subr.bf16.mxu0 %v3693_v22  ;;  %v3734_v22 = vld [vmem:[%s4280_s17 + $0x80] sm:$0xff]  }
 0x99c   : > { %2253 = vmatpush1.bf16.msra.mxu0 %v3691_v24  ;;  %v2074_v24 = vsub.s32 3, %v4324_v48 }
 0x99d   : > { %2254 = vmatprep.subr.bf16.mxu0 %v3699_v26  ;;  %v2071_v26 = vrot.slane %v2058_v23, %v905_v34 }
 0x9a0   : > { %2255 = vmatpush1.bf16.msra.mxu0 %v3697_v3  ;;  %v2075_v3 = vrot.slane %v2058_v23, %v2074_v24 }
 0xa12   : > { %v1989_v61 = vpop.xlane.xlu1 %1988 }
 0xa13   : > { %v1992_v62 = vmul.f32 0.0078125, %v1989_v61  ;;  %v3714_v61 = vld [vmem:[%s4280_s17 + $0xa8] sm:$0xff]  }
 0xa15   : > { %v4559_v63 = vsub.f32 %v1983_v47, %v1992_v62  ;;  %v3703_v47 = vld [vmem:[%s4280_s17 + $0x78] sm:$0xff]   ;;  %v3715_v62 = vld [vmem:[%s4280_s17 + $0x60] sm:$0xff]  }
 0xa16   : > { %v1998_v30 = vpop.xlane.xlu1 %1997  ;;  %3351 = vmatprep.subr.bf16.mxu0 %v3703_v47 }
 0xa17   : > { %v1996_v1 = vmul.f32 %v4559_v63, %v4559_v63  ;;  %v2001_v31 = vmul.f32 0.0078125, %v1998_v30 }
 0xa19   : > { %1999 = vadd.xlane.f32.xlu1 %v1996_v1  ;;  %v2003_v5 = vadd.f32 1e-12, %v2001_v31  ;;  %v3717_v1 = vld [vmem:[%s4280_s17 + $0x20] sm:$0xff]  }
 0xa1b   : > { %3751 = vrsqrt.f32 %v2003_v5 }
 0xa28   : > { %v3752_v7 = vpop.eup %3751 }
 0xa29   : > { %v2007_v33 = vmul.f32 %v3752_v7, %v4546_v28 }
 0xa2b   : > { %v2015_v39 = vmul.f32 %v3229_v35, %v2007_v33 }
 0xa2d   : > { %v4599_v42 = vadd.f32 %v3230_v40, %v2015_v39 }
 0xaa2   : > { %v2000_v32 = vpop.xlane.xlu1 %1999 }
 0xaa3   : > { %v2002_v46 = vmul.f32 0.0078125, %v2000_v32 }
 0xaa5   : > { %v2004_v6 = vadd.f32 1e-12, %v2002_v46 }
 0xaa7   : > { %3753 = vrsqrt.f32 %v2004_v6 }
 0xab4   : > { %v3754_v36 = vpop.eup %3753 }
 0xab5   : > { %v2008_v37 = vmul.f32 %v3754_v36, %v4559_v63  ;;  %v3716_v63 = vld [vmem:[%s4280_s17 + $0xe0] sm:$0xff]  }
 0xab7   : > { %v2016_v41 = vmul.f32 %v3229_v35, %v2008_v37 }
 0xab9   : > { %v4601_v45 = vadd.f32 %v3230_v40, %v2016_v41 }
 0xabb   : > { %v2025_v28 = vpack.c.bf16 %v4601_v45, %v4599_v42 }
 0xabd   : > { %2273 = vmatmul.mubr.bf16.vlgmr.msra.gmra.mxu0 %v2025_v28  ;;  %2316 = vmatmul.mubr.bf16.vlgmr.msra.gmra.mxu1 %v2025_v28 }
 0xabe   : > { %3352 = vmatpush3.bf16.msra.mxu0 %v3705_v51  ;;  %3374 = vmatpush3.bf16.msra.mxu1 %v3706_v52 }
 0xabf   : > { %3353 = vmatprep.subr.bf16.mxu0 %v3707_v54  ;;  %3375 = vmatprep.subr.bf16.mxu1 %v3708_v56 }
 0xac2   : > { %3354 = vmatpush3.bf16.msra.mxu0 %v3709_v57  ;;  %3376 = vmatpush3.bf16.msra.mxu1 %v3710_v58 }
 0xac3   : > { %3355 = vmatprep.subr.bf16.mxu0 %v3711_v59  ;;  %3377 = vmatprep.subr.bf16.mxu1 %v3712_v44 }
 0xac6   : > { %3356 = vmatpush3.bf16.msra.mxu0 %v3713_v60  ;;  %3378 = vmatpush3.bf16.msra.mxu1 %v3714_v61 }
 0xac7   : > { %3357 = vmatprep.subr.bf16.mxu0 %v3715_v62  ;;  %3379 = vmatprep.subr.bf16.mxu1 %v3716_v63 }
 0xaca   : > { %3358 = vmatpush3.bf16.msra.mxu0 %v3717_v1  ;;  %3380 = vmatpush3.bf16.msra.mxu1 %v3718_v4 }
 0xacb   : > { %3359 = vmatprep.subr.bf16.mxu0 %v3719_v9  ;;  %3381 = vmatprep.subr.bf16.mxu1 %v3720_v10 }
 0xace   : > { %3360 = vmatpush3.bf16.msra.mxu0 %v3721_v38  ;;  %3382 = vmatpush3.bf16.msra.mxu1 %v3722_v8 }
 0xacf   : > { %3361 = vmatprep.subr.bf16.mxu0 %v3723_v43  ;;  %3383 = vmatprep.subr.bf16.mxu1 %v3724_v11 }
 0xad2   : > { %3362 = vmatpush3.bf16.msra.mxu0 %v3725_v12  ;;  %3384 = vmatpush3.bf16.msra.mxu1 %v3726_v13 }
 0xad3   : > { %3363 = vmatprep.subr.bf16.mxu0 %v3727_v14  ;;  %3385 = vmatprep.subr.bf16.mxu1 %v3728_v15 }
 0xad6   : > { %3364 = vmatpush3.bf16.msra.mxu0 %v3729_v16  ;;  %3386 = vmatpush3.bf16.msra.mxu1 %v3730_v17 }
 0xad7   : > { %3365 = vmatprep.subr.bf16.mxu0 %v3731_v18  ;;  %3387 = vmatprep.subr.bf16.mxu1 %v3732_v20 }
 0xada   : > { %3366 = vmatpush3.bf16.msra.mxu0 %v3733_v21  ;;  %3388 = vmatpush3.bf16.msra.mxu1 %v3734_v22 }
 0xb7d   : > { %v2274_v29 = vpop.f32.mrf.mxu0  ;;  %v2317_v30 = vpop.f32.mrf.mxu1 }
 0xb7e   : > { %v4645_v31 = vadd.f32 %v2274_v29, %v2063_v25  ;;  %v4647_v5 = vadd.f32 %v2317_v30, %v2071_v26 }
 0xb7f   : > { %v2276_v32 = vpop.f32.mrf.mxu0  ;;  %v2319_v46 = vpop.f32.mrf.mxu1 }
 0xb80   : > { %v2334_v6 = vmul.f32 0.044715, %v4645_v31  ;;  %v2336_v7 = vmul.f32 0.044715, %v4647_v5  ;;  %v2277_v53 = vadd.f32 %v2276_v32, %v2067_v27  ;;  %v4651_v33 = vadd.f32 %v2319_v46, %v2075_v3 }
 0xb81   : > { %v2278_v34 = vpop.f32.mrf.mxu0  ;;  %v2321_v35 = vpop.f32.mrf.mxu1 }
 0xb82   : > { %v2342_v48 = vmul.f32 %v2334_v6, %v4645_v31  ;;  %v2344_v49 = vmul.f32 %v2336_v7, %v4647_v5  ;;  %v2335_v36 = vmul.f32 0.044715, %v2277_v53  ;;  %v2337_v37 = vmul.f32 0.044715, %v4651_v33 }
 0xb83   : > { %v2279_v39 = vadd.f32 %v2278_v34, %v2063_v25  ;;  %v4656_v40 = vadd.f32 %v2321_v35, %v2071_v26  ;;  %v2280_v41 = vpop.f32.mrf.mxu0  ;;  %v2323_v28 = vpop.f32.mrf.mxu1  ;;  %v2327_v6 = vmul.f32 0.5, %v2277_v53  ;;  %v2326_v34 = vmul.f32 0.5, %v4645_v31 }
 0xb84   : > { %v2350_v47 = vmul.f32 %v2342_v48, %v4645_v31  ;;  %v2352_v50 = vmul.f32 %v2344_v49, %v4647_v5  ;;  %v2343_v51 = vmul.f32 %v2335_v36, %v2277_v53  ;;  %v2345_v52 = vmul.f32 %v2337_v37, %v4651_v33 }
 0xb85   : > { %v2338_v54 = vmul.f32 0.044715, %v2279_v39  ;;  %v2340_v56 = vmul.f32 0.044715, %v4656_v40  ;;  %v2281_v57 = vadd.f32 %v2280_v41, %v2067_v27  ;;  %v2324_v58 = vadd.f32 %v2323_v28, %v2075_v3 }
 0xb86   : > { %v2358_v59 = vadd.f32 %v2350_v47, %v4645_v31  ;;  %v2360_v44 = vadd.f32 %v2352_v50, %v4647_v5  ;;  %v2351_v60 = vmul.f32 %v2343_v51, %v2277_v53  ;;  %v2353_v61 = vmul.f32 %v2345_v52, %v4651_v33 }
 0xb87   : > { %v2346_v62 = vmul.f32 %v2338_v54, %v2279_v39  ;;  %v2348_v63 = vmul.f32 %v2340_v56, %v4656_v40  ;;  %v2339_v1 = vmul.f32 0.044715, %v2281_v57  ;;  %v2341_v4 = vmul.f32 0.044715, %v2324_v58 }
 0xb88   : > { %v2366_v9 = vmul.f32 0.7978846, %v2358_v59  ;;  %v2368_v10 = vmul.f32 0.7978846, %v2360_v44  ;;  %v2359_v38 = vadd.f32 %v2351_v60, %v2277_v53  ;;  %v2361_v14 = vadd.f32 %v2353_v61, %v4651_v33 }
 0xb89   : > { %v2354_v8 = vmul.f32 %v2346_v62, %v2279_v39  ;;  %v2356_v43 = vmul.f32 %v2348_v63, %v4656_v40  ;;  %v2347_v11 = vmul.f32 %v2339_v1, %v2281_v57  ;;  %v2349_v12 = vmul.f32 %v2341_v4, %v2324_v58 }
 0xb8a   : > { %v2367_v13 = vmul.f32 0.7978846, %v2359_v38  ;;  %3755 = vtanh.f32 %v2366_v9  ;;  %v2369_v20 = vmul.f32 0.7978846, %v2361_v14  ;;  %v2330_v36 = vmul.f32 0.5, %v2279_v39 }
 0xb8b   : > { %v2362_v15 = vadd.f32 %v2354_v8, %v2279_v39  ;;  %v2364_v16 = vadd.f32 %v2356_v43, %v4656_v40  ;;  %v2355_v17 = vmul.f32 %v2347_v11, %v2281_v57  ;;  %3757 = vtanh.f32 %v2368_v10 }
 0xb8c   : > { %v2357_v18 = vmul.f32 %v2349_v12, %v2324_v58  ;;  %3759 = vtanh.f32 %v2367_v13  ;;  %v2331_v47 = vmul.f32 0.5, %v2281_v57  ;;  %v2332_v51 = vmul.f32 0.5, %v4656_v40 }
 0xb8d   : > { %v2370_v21 = vmul.f32 0.7978846, %v2362_v15  ;;  %v2372_v22 = vmul.f32 0.7978846, %v2364_v16  ;;  %v2363_v23 = vadd.f32 %v2355_v17, %v2281_v57  ;;  %3761 = vtanh.f32 %v2369_v20 }
 0xb8e   : > { %v2365_v24 = vadd.f32 %v2357_v18, %v2324_v58  ;;  %v2329_v54 = vmul.f32 0.5, %v4651_v33  ;;  %v2333_v56 = vmul.f32 0.5, %v2324_v58  ;;  %v2328_v31 = vmul.f32 0.5, %v4647_v5  ;;  %v3263_v5 = vld [vmem:[%s797_s20] ss:$0 sm:$0xff]  ;;  %s3949_s20 = smov 8  }
 0xb8f   : > { %3763 = vtanh.f32 %v2370_v21  ;;  %v2371_v25 = vmul.f32 0.7978846, %v2363_v23 }
 0xb90   : > { %3765 = vtanh.f32 %v2372_v22  ;;  %v2373_v26 = vmul.f32 0.7978846, %v2365_v24  ;;  %v1500_v24 = vrot.slane %v4396_v55, 1 }
 0xb91   : > { %3767 = vtanh.f32 %v2371_v25  ;;  %v1897_v25 = vrot.slane %v4517_v19, 1 }
 0xb92   : > { %3769 = vtanh.f32 %v2373_v26  ;;  %v1901_v26 = vrot.slane %v4517_v19, 2 }
 0xb97   : > { %v3756_v27 = vpop.eup %3755 }
 0xb98   : > { %v3758_v3 = vpop.eup %3757  ;;  %v2382_v37 = vadd.f32 1.0, %v3756_v27  ;;  %v1508_v27 = vrot.slane %v4396_v55, 3 }
 0xb99   : > { %v3760_v29 = vpop.eup %3759  ;;  %v2384_v52 = vadd.f32 1.0, %v3758_v3  ;;  %v1909_v3 = vrot.slane %v4517_v19, 4 }
 0xb9a   : > { %v3762_v30 = vpop.eup %3761  ;;  %v2383_v7 = vadd.f32 1.0, %v3760_v29  ;;  %v2390_v63 = vmul.f32 %v2382_v37, %v2326_v34  ;;  %v1913_v29 = vrot.slane %v4517_v19, 5  ;;  %v1941_v34 = vrot.slane %v4526_v0, 4 }
 0xb9b   : > { %v2385_v49 = vadd.f32 1.0, %v3762_v30  ;;  %v2392_v57 = vmul.f32 %v2384_v52, %v2328_v31  ;;  %v1917_v30 = vrot.slane %v4517_v19, 6 }
 0xb9c   : > { %v3764_v32 = vpop.eup %3763  ;;  %v2391_v44 = vmul.f32 %v2383_v7, %v2327_v6  ;;  %v1933_v6 = vrot.slane %v4526_v0, 2  ;;  %v1937_v7 = vrot.slane %v4526_v0, 3 }
 0xb9d   : > { %v3766_v46 = vpop.eup %3765  ;;  %v2386_v35 = vadd.f32 1.0, %v3764_v32  ;;  %v2393_v39 = vmul.f32 %v2385_v49, %v2329_v54  ;;  %v1921_v32 = vrot.slane %v4517_v19, 7  ;;  %v1953_v49 = vrot.slane %v4526_v0, 7 }
 0xb9e   : > { %v3768_v48 = vpop.eup %3767  ;;  %v2388_v41 = vadd.f32 1.0, %v3766_v46  ;;  %v1929_v46 = vrot.slane %v4526_v0, 1 }
 0xb9f   : > { %v3770_v28 = vpop.eup %3769  ;;  %v2387_v50 = vadd.f32 1.0, %v3768_v48  ;;  %v2394_v53 = vmul.f32 %v2386_v35, %v2330_v36  ;;  %v1945_v35 = vrot.slane %v4526_v0, 5  ;;  %v1949_v48 = vrot.slane %v4526_v0, 6  ;;  %v1506_v36 = vpop.permute.xlu0 %1505 }
 0xba0   : > { %v2389_v59 = vadd.f32 1.0, %v3770_v28  ;;  %v2396_v61 = vmul.f32 %v2388_v41, %v2332_v51 }
 0xba1   : > { %v2395_v60 = vmul.f32 %v2387_v50, %v2331_v47  ;;  %v2398_v9 = vpack.c.bf16 %v2394_v53, %v2390_v63 }
 0xba2   : > { %v2397_v62 = vmul.f32 %v2389_v59, %v2333_v56  ;;  %v2400_v40 = vpack.c.bf16 %v2396_v61, %v2392_v57 }
 0xba3   : > { %v2399_v1 = vpack.c.bf16 %v2395_v60, %v2391_v44  ;;  %v1518_v37 = vpop.permute.xlu0 %1517 }
 0xba4   : > { %v2401_v4 = vpack.c.bf16 %v2397_v62, %v2393_v39 }
 0xba5   : > { %2697 = vmatprep.mubr.bf16.mxu0 %v2399_v1 }
 0xba6   : > { %2738 = vmatprep.mubr.bf16.mxu1 %v2401_v4  ;;  %2698 = vmatmul.mubr.bf16.vlgmr.msra.gmra.mxu0 %v2398_v9 }
 0xba7   : > { %2739 = vmatmul.mubr.bf16.vlgmr.msra.gmra.mxu1 %v2400_v40  ;;  %v1522_v41 = vpop.permute.xlu0 %1521 }
 0xbab   : > { %v1526_v47 = vpop.permute.xlu0 %1525 }
 0xbaf   : > { %v1530_v59 = vpop.permute.xlu0 %1529 }
 0xbb3   : > { %v1534_v39 = vpop.permute.xlu0 %1533 }
 0xbb7   : > { %v1538_v63 = vpop.permute.xlu0 %1537 }
 0xbbb   : > { %v1542_v9 = vpop.permute.xlu0 %1541 }
 0xc66   : > { %v3367_v33 = vpop.f32.mrf.mxu0 }
 0xc67   : > { %v3389_v58 = vpop.f32.mrf.mxu1 }
 0xc68   : > { %v3368_v10 = vpop.f32.mrf.mxu0 }
 0xc69   : > { %v3369_v38 = vadd.f32 %v3368_v10, %v3367_v33  ;;  %v3390_v8 = vpop.f32.mrf.mxu1 }
 0xc6a   : > { %v3370_v43 = vpop.f32.mrf.mxu0  ;;  %v3391_v12 = vadd.f32 %v3390_v8, %v3389_v58  ;;  %v1546_v58 = vpop.permute.xlu0 %1545 }
 0xc6b   : > { %v2700_v11 = vadd.f32 %v3369_v38, %v3263_v5  ;;  %v3392_v13 = vpop.f32.mrf.mxu1 }
 0xc6c   : > { %v3371_v14 = vpop.f32.mrf.mxu0 }
 0xc6d   : > { %v2741_v15 = vadd.f32 %v3391_v12, %v2700_v11  ;;  %v3372_v16 = vadd.f32 %v3371_v14, %v3370_v43  ;;  %v3393_v17 = vpop.f32.mrf.mxu1  ;;  %v1556_v12 = vrot.slane %v4422_v2, 7 }
 0xc6e   : > { %v3394_v20 = vadd.f32 %v3393_v17, %v3392_v13 }
 0xc6f   : > { %v2703_v18 = vadd.f32 %v3372_v16, %v3263_v5  ;;  %v2747_v21 = vadd.f32 %v2741_v15, %v4599_v42  ;;  %v1905_v42 = vrot.slane %v4517_v19, 3  ;;  %v1552_v5 = vrot.slane %v4422_v2, 6  ;;  %v1550_v16 = vpop.permute.xlu0 %1549 }
 0xc71   : > { %v2744_v22 = vadd.f32 %v3394_v20, %v2703_v18  ;;  %2751 = vadd.xlane.f32.xlu1 %v2747_v21 }
 0xc73   : > { %v2748_v23 = vadd.f32 %v2744_v22, %v4601_v45  ;;  %v1512_v45 = vrot.slane %v4396_v55, 4 }
 0xc75   : > { %2753 = vadd.xlane.f32.xlu1 %v2748_v23 }
 0xc86   : > { %1501 = vrot.lane.b32.xlu1 %v1500_v24, %s3949_s20 }
 0xc8a   : > { %1898 = vrot.lane.b32.xlu1 %v1897_v25, %s3949_s20 }
 0xc8e   : > { %1902 = vrot.lane.b32.xlu1 %v1901_v26, %s3940_s21  ;;  %s3953_s21 = smov 120  }
 0xc92   : > { %1509 = vrot.lane.b32.xlu1 %v1508_v27, %s3950_s16 }
 0xc96   : > { %1906 = vrot.lane.b32.xlu1 %v1905_v42, %s3950_s16 }
 0xc9a   : > { %1513 = vrot.lane.b32.xlu1 %v1512_v45, %s3951_s29 }
 0xc9e   : > { %1910 = vrot.lane.b32.xlu1 %v1909_v3, %s3951_s29 }
 0xca2   : > { %1914 = vrot.lane.b32.xlu1 %v1913_v29, %s3941_s19 }
 0xca6   : > { %1918 = vrot.lane.b32.xlu1 %v1917_v30, %s3942_s9 }
 0xcaa   : > { %1922 = vrot.lane.b32.xlu1 %v1921_v32, %s3943_s18 }
 0xcae   : > { %1926 = vrot.lane.b32.xlu1 %v4526_v0, %s3939_s13  ;;  %s3952_s13 = smov 112  }
 0xcb2   : > { %1930 = vrot.lane.b32.xlu1 %v1929_v46, %s3944_s22 }
 0xcb6   : > { %1934 = vrot.lane.b32.xlu1 %v1933_v6, %s3945_s26 }
 0xcba   : > { %1938 = vrot.lane.b32.xlu1 %v1937_v7, %s3946_s15 }
 0xcbe   : > { %1942 = vrot.lane.b32.xlu1 %v1941_v34, %s3947_s3  ;;  %s4876_s3 = sld [smem:[#allocation28_spill]] (!%p3298_p5) }
 0xcc2   : > { %1946 = vrot.lane.b32.xlu1 %v1945_v35, %s3948_s28  ;;  %s4877_s28 = sld [smem:[#allocation29_spill]] (!%p3298_p5) }
 0xcc6   : > { %1950 = vrot.lane.b32.xlu1 %v1949_v48, %s3952_s13 }
 0xcc8   : > { %s4878_s23 = smov (!%p3298_p5), %s4877_s28 }
 0xcca   : > { %1954 = vrot.lane.b32.xlu1 %v1953_v49, %s3953_s21 }
 0xcfa   : > { %v2752_v28 = vpop.xlane.xlu1 %2751 }
 0xcfb   : > { %v2755_v50 = vmul.f32 0.0078125, %v2752_v28 }
 0xcfd   : > { %v4710_v51 = vsub.f32 %v2747_v21, %v2755_v50 }
 0xcfe   : > { %v2754_v52 = vpop.xlane.xlu1 %2753 }
 0xcff   : > { %v2756_v54 = vmul.f32 0.0078125, %v2754_v52  ;;  %v2759_v56 = vmul.f32 %v4710_v51, %v4710_v51 }
 0xd01   : > { %v4714_v53 = vsub.f32 %v2748_v23, %v2756_v54  ;;  %2761 = vadd.xlane.f32.xlu0 %v2759_v56 }
 0xd02   : > { %v1502_v0 = vpop.permute.xlu1 %1501 }
 0xd03   : > { %v1560_v44 = vsel %vm1189_vm2, %v4396_v55, %v1502_v0  ;;  %v2760_v60 = vmul.f32 %v4714_v53, %v4714_v53 }
 0xd04   : > { %v1562_v31 = vsel %vm1561_vm4, %v1560_v44, %v1506_v36 }
 0xd05   : > { %2763 = vadd.xlane.f32.xlu0 %v2760_v60 }
 0xd06   : > { %v1899_v61 = vpop.permute.xlu1 %1898 }
 0xd07   : > { %v1957_v2 = vsel %vm1189_vm2, %v4517_v19, %v1899_v61 }
 0xd0a   : > { %v1903_v62 = vpop.permute.xlu1 %1902 }
 0xd0b   : > { %v1958_v26 = vsel %vm1561_vm4, %v1957_v2, %v1903_v62 }
 0xd0e   : > { %v1510_v1 = vpop.permute.xlu1 %1509 }
 0xd0f   : > { %v1564_v57 = vsel %vm1563_vm5, %v1562_v31, %v1510_v1  ;;  %v3296_v31 = vld [vmem:[%s800_s4] ss:$0 sm:$0xff] }
 0xd12   : > { %v1907_v4 = vpop.permute.xlu1 %1906 }
 0xd13   : > { %v1959_v42 = vsel %vm1563_vm5, %v1958_v26, %v1907_v4 }
 0xd16   : > { %v1514_v40 = vpop.permute.xlu1 %1513 }
 0xd17   : > { %v1566_v55 = vsel %vm1565_vm6, %v1564_v57, %v1514_v40 }
 0xd18   : > { %v1568_v33 = vsel %vm1567_vm7, %v1566_v55, %v1518_v37 }
 0xd19   : > { %v1570_v10 = vsel %vm1569_vm8, %v1568_v33, %v1522_v41 }
 0xd1a   : > { %v1911_v38 = vpop.permute.xlu1 %1910  ;;  %v1572_v8 = vsel %vm1571_vm9, %v1570_v10, %v1526_v47 }
 0xd1b   : > { %1553 = vrot.lane.b32.xlu0 %v1552_v5, %s3952_s13  ;;  %v1573_v43 = vsel %vm1141_vm1, %v1572_v8, %v1530_v59  ;;  %v1960_v45 = vsel %vm1565_vm6, %v1959_v42, %v1911_v38 }
 0xd1c   : > { %v1575_v11 = vsel %vm1574_vm10, %v1573_v43, %v1534_v39  ;;  %v3297_v39 = vld [vmem:[%s803_s11] ss:$0 sm:$0xff] }
 0xd1d   : > { %v1577_v13 = vsel %vm1576_vm11, %v1575_v11, %v1538_v63 }
 0xd1e   : > { %v1915_v14 = vpop.permute.xlu1 %1914  ;;  %v1579_v15 = vsel %vm1578_vm12, %v1577_v13, %v1542_v9 }
 0xd1f   : > { %1557 = vrot.lane.b32.xlu0 %v1556_v12, %s3953_s21  ;;  %v1581_v17 = vsel %vm1580_vm13, %v1579_v15, %v1546_v58  ;;  %v1961_v3 = vsel %vm1567_vm7, %v1960_v45, %v1915_v14 }
 0xd20   : > { %v1583_v18 = vsel %vm1582_vm14, %v1581_v17, %v1550_v16 }
 0xd22   : > { %v1919_v20 = vpop.permute.xlu1 %1918 }
 0xd23   : > { %v1962_v29 = vsel %vm1569_vm8, %v1961_v3, %v1919_v20 }
 0xd26   : > { %v1923_v21 = vpop.permute.xlu1 %1922 }
 0xd27   : > { %v1963_v32 = vsel %vm1571_vm9, %v1962_v29, %v1923_v21 }
 0xd2a   : > { %v1927_v22 = vpop.permute.xlu1 %1926 }
 0xd2b   : > { %v1964_v46 = vsel %vm1141_vm1, %v1963_v32, %v1927_v22 }
 0xd2e   : > { %v1931_v23 = vpop.permute.xlu1 %1930 }
 0xd2f   : > { %v1965_v6 = vsel %vm1574_vm10, %v1964_v46, %v1931_v23 }
 0xd32   : > { %v1935_v24 = vpop.permute.xlu1 %1934 }
 0xd33   : > { %v1966_v19 = vsel %vm1576_vm11, %v1965_v6, %v1935_v24 }
 0xd36   : > { %v1939_v25 = vpop.permute.xlu1 %1938 }
 0xd37   : > { %v1967_v34 = vsel %vm1578_vm12, %v1966_v19, %v1939_v25 }
 0xd3a   : > { %v1943_v27 = vpop.permute.xlu1 %1942 }
 0xd3b   : > { %v1968_v35 = vsel %vm1580_vm13, %v1967_v34, %v1943_v27 }
 0xd3e   : > { %v1947_v30 = vpop.permute.xlu1 %1946 }
 0xd3f   : > { %v1969_v48 = vsel %vm1582_vm14, %v1968_v35, %v1947_v30 }
 0xd42   : > { %v1951_v7 = vpop.permute.xlu1 %1950 }
 0xd43   : > { %v1970_v49 = vsel %vm1584_vm15, %v1969_v48, %v1951_v7 }
 0xd46   : > { %v1955_v36 = vpop.permute.xlu1 %1954 }
 0xd47   : > { %v1971_v37 = vsel %vm1586_vm0, %v1970_v49, %v1955_v36 }
 0xd48   : > { %1972 = vst [vmem:[%s4278_s8 + $0x1] sm:$0x1] %v1971_v37 }
 0xd8a   : > { %v2762_v41 = vpop.xlane.xlu0 %2761 }
 0xd8b   : > { %v2765_v28 = vmul.f32 0.0078125, %v2762_v41 }
 0xd8d   : > { %v2767_v47 = vadd.f32 1e-12, %v2765_v28 }
 0xd8e   : > { %v2764_v50 = vpop.xlane.xlu0 %2763 }
 0xd8f   : > { %3771 = vrsqrt.f32 %v2767_v47  ;;  %v2766_v52 = vmul.f32 0.0078125, %v2764_v50 }
 0xd91   : > { %v2768_v54 = vadd.f32 1e-12, %v2766_v52 }
 0xd92   : > { %v1554_v56 = vpop.permute.xlu0 %1553 }
 0xd93   : > { %3773 = vrsqrt.f32 %v2768_v54  ;;  %v1585_v59 = vsel %vm1584_vm15, %v1583_v18, %v1554_v56 }
 0xd96   : > { %v1558_v0 = vpop.permute.xlu0 %1557 }
 0xd97   : > { %v1587_v44 = vsel %vm1586_vm0, %v1585_v59, %v1558_v0 }
 0xd98   : > { %1588 = vst [vmem:[%s4278_s8] sm:$0x1] %v1587_v44 }
 0xd9c   : > { %v3772_v60 = vpop.eup %3771 }
 0xd9d   : > { %v2771_v61 = vmul.f32 %v3772_v60, %v4710_v51 }
 0xd9f   : > { %v2779_v62 = vmul.f32 %v3296_v31, %v2771_v61 }
 0xda0   : > { %v3774_v63 = vpop.eup %3773 }
 0xda1   : > { %v2787_v1 = vadd.f32 %v3297_v39, %v2779_v62  ;;  %v2772_v57 = vmul.f32 %v3774_v63, %v4714_v53 }
 0xda3   : > { %2789 = vst [vmem:[#allocation2] sm:$0xff] %v2787_v1  ;;  %v2780_v4 = vmul.f32 %v3296_v31, %v2772_v57  ;;  %2794 = sbr.rel (%p3298_p5) target bundleno = 3697 (0xe71), region = 108 }
 0xda5   : > { %v2788_v9 = vadd.f32 %v3297_v39, %v2780_v4 }
 0xda7   : > { %2790 = vst [vmem:[#allocation2 + $0x8] sm:$0xff] %v2788_v9 }
 0xda8   : > { %v2795_v51 = vld [vmem:[%s4876_s3] sm:$0xff]  ;;  %v3954_v40 = vmov 0.0   ;;  %vm3955_vm1 = vmmov 0   ;;  %vm2867_vm2 = vcmask 57344  }
 0xda9   : > { %3515 = vmatprep.subr.mxu0 %v3954_v40  ;;  %3520 = vmatprep.subr.mxu1 %v3954_v40  ;;  %v2796_v53 = vld [vmem:[%s4877_s28] sm:$0x1] }
 0xdaa   : > { %3516 = vmatpush3.xpose.msra.mxu0 %v2795_v51  ;;  %3521 = vmatpush3.xpose.msra.mxu1 %v2795_v51  ;;  %v2870_v55 = vld [vmem:[%s4878_s23] sm:$0x1] }
 0xdab   : > { %3517 = vmatprep.mubr.msk.f32.mxu0 %vm3955_vm1, %v3954_v40  ;;  %3522 = vmatprep.mubr.msk.f32.mxu1 %vm3955_vm1, %v3954_v40 }
 0xdad   : > { %3518 = vmatmul.mubr.f32.vlgmr.msra.gmra.mxu0 %v2787_v1  ;;  %3523 = vmatmul.mubr.f32.vlgmr.msra.gmra.mxu1 %v2788_v9 }
 0xe6d   : > { %v2863_v33 = vpop.f32.mrf.mxu0  ;;  %v2937_v58 = vpop.f32.mrf.mxu1 }
 0xe6e   : > { %v2864_v5 = vadd.f32 %v2863_v33, %v2796_v53  ;;  %v2938_v10 = vadd.f32 %v2937_v58, %v2870_v55 }
 0xe6f   : > { %v3519_v38 = vpop.f32.mrf.mxu0  ;;  %v3524_v8 = vpop.f32.mrf.mxu1 }
 0xe70   : > { %2868 = vst.msk [vmem:[#allocation9] sm:$0x1] %vm2867_vm2, %v2864_v5  ;;  %2941 = vst.msk [vmem:[#allocation9 + $0x1] sm:$0x1] %vm2867_vm2, %v2938_v10 }
 0xe71 PF: > { %p3550_p6 = scmp.eq.s32.totalorder %s4071_s0, 1  ;;  %s3956_s27 = smov [#allocation9]  }
 0xe72   : > { %s2953_s1 = sshll.u32 %s3956_s27, 4  ;;  %s2954_s1 = int_to_ptr.vmem [resolvable:$true] %s2953_s1 }
 0xe73   : > { %s3859_s25 = scalar_lea.vmem %s2954_s1, 32  ;;  %p3866_p12 = scmp.lt.s32.totalorder %s2954_s1, %s2954_s1 }
 0xe74   : > { %p3860_p9 = scmp.ne.s32.totalorder %s2954_s1, %s3859_s25  ;;  %p3867_p0 = scmp.lt.s32.totalorder %s3859_s25, %s3859_s25 }
 0xe76   : > { %p3861_p11 = pnand %p3860_p9, %p3550_p6  ;;  %p3868_p1 = por %p3867_p0, %p3866_p12 }
 0xe78   : > { %p3862_p7 = pneg %p3861_p11 }
 0xe7a   : > { %p3869_p2 = pnand %p3868_p1, %p3862_p7 }
 0xe7c   : > { %3872 = shalt.err (!%p3869_p2)
}
 0xe7d   : > { %s4879_s20 = sld [smem:[#allocation30_spill]] }
 0xe83   : > { %3536 = dma.vmem_to_hbm [thread:$0]  (%p3550_p6), %s2954_s1, 32, %s4879_s20, [#allocation5]  }
 0xe84   : > { %3908 = dma.done.wait (%p3550_p6), [#allocation5], 32  }
 0xe85   : > { %3910 = vsyncadd (%p3550_p6), [#allocation5], 4294967264 }
 0xe86 PF: > { %s4880_s30 = sld [smem:[#allocation15_spill]] }
 0xe87   : > { %s4881_s27 = sld [smem:[#allocation13_spill]] }
 0xe88   : > { %s4882_s28 = sld [smem:[#allocation14_spill]] }
 0xe89   : > { %s4883_s29 = sld [smem:[#allocation16_spill]] }
 0xe8c   : > { %p33_p3 = scmp.ge.s32.totalorder %s4880_s30, 4  }
 0xe8e   :  { %35 = sbr.rel (!%p33_p3) target bundleno = 22 (0x16), region = 196 }
 0xe93   :  { %2976 = vsyncpa [#allocation4], 1 }
 0xe94   :  { %2978 = vsyncpa [#allocation4 + $0x1], 1 }
 0xe95   :  { %2979 = vsyncpa [#allocation7], 1 }
 0xe96   :  { %2981 = vsyncpa [#allocation7 + $0x1], 1 }
 0xe97   :  { %2982 = vsyncpa [#allocation5], 1 }
 0xe98   :  { %2984 = vsyncpa [#allocation5 + $0x1], 1 }

</bundles_post_ra>
